<compile_context>
chip_gen: v5e
topology: v5e:2x2
jax: 0.10.0
libtpu: 0.0.40
codegen_flags: <defaults>
</compile_context>

<pallas_src>
import functools
import math

import jax
import jax.numpy as jnp
from jax.experimental import pallas as pl
from jax.experimental.pallas import tpu as pltpu

# ----------------------------- small synthetic config -----------------------------
VOCAB = 64
MAX_POS = 16
TYPE_VOCAB = 2
HIDDEN = 32
NUM_LAYERS = 2
NUM_HEADS = 4
HEAD_DIM = HIDDEN // NUM_HEADS
INTERMEDIATE = 64
PROJ_DIM = 16
LN_EPS = 1e-12

_VMEM_SPEC = pl.BlockSpec(memory_space=pltpu.MemorySpace.VMEM)


# --------------------------------- kernel helpers ----------------------------------
def _layernorm(x, gamma, beta, eps):
    """LayerNorm over the last axis; gamma/beta are (1, H) and broadcast over rows."""
    mu = jnp.mean(x, axis=-1, keepdims=True)
    xc = x - mu
    var = jnp.mean(xc * xc, axis=-1, keepdims=True)
    return xc * jax.lax.rsqrt(var + eps) * gamma + beta


def _gelu(x):
    # tanh-approx GELU (float32 on the VPU/EUP).
    # TODO(synk): HF BiomedBERT uses exact erf GELU; tanh approximation kept here.
    return 0.5 * x * (1.0 + jnp.tanh(0.7978845608028654 * (x + 0.044715 * x * x * x)))


def _bf16(x):
    return x.astype(jnp.bfloat16)


# ---------------------------------- fused kernel -----------------------------------
def _encoder_kernel(
    word_ref, pos_ref, type_ref, emb_g_ref, emb_b_ref,
    wqkv_ref, bqkv_ref, wo_ref, bo_ref, ln1g_ref, ln1b_ref,
    w1_ref, b1_ref, w2_ref, b2_ref, ln2g_ref, ln2b_ref,
    pool_w_ref, pool_b_ref, proj_ref,
    out_ref,
    *, batch, seq, num_layers, num_heads, head_dim, eps,
):
    hidden = num_heads * head_dim

    # ---- embeddings (word + position + token-type) fused with LayerNorm ----
    pos = pos_ref[...]                                           # (S, H)
    pos_tiled = jnp.concatenate([pos] * batch, axis=0)           # (B*S, H)
    x = word_ref[...] + pos_tiled + type_ref[...]                # type (1,H) broadcasts
    h = _layernorm(x, emb_g_ref[...], emb_b_ref[...], eps)       # (B*S, H) f32

    # ---- transformer layers (statically unrolled; everything stays in VMEM) ----
    for layer in range(num_layers):
        # fused QKV projection: (B*S, H) @ (H, 3H); 1/sqrt(dh) already folded into W_q
        qkv = jnp.dot(_bf16(h), wqkv_ref[layer],
                      preferred_element_type=jnp.float32) + bqkv_ref[layer]
        q = qkv[:, :hidden]
        k = qkv[:, hidden:2 * hidden]
        v = qkv[:, 2 * hidden:]

        # per-(batch, head) scaled-dot-product attention, fully in-kernel.
        ctx_rows = []
        for b in range(batch):
            r0 = b * seq
            head_ctx = []
            for hd in range(num_heads):
                c0 = hd * head_dim
                q_bh = q[r0:r0 + seq, c0:c0 + head_dim]          # (S, DH)
                k_bh = k[r0:r0 + seq, c0:c0 + head_dim]
                v_bh = v[r0:r0 + seq, c0:c0 + head_dim]
                s = jnp.einsum("qd,kd->qk", q_bh, k_bh,
                               preferred_element_type=jnp.float32)
                m = jnp.max(s, axis=-1, keepdims=True)
                p = jnp.exp(s - m)
                p = p * pl.reciprocal(jnp.sum(p, axis=-1, keepdims=True), approx=True)
                head_ctx.append(jnp.dot(p, v_bh, preferred_element_type=jnp.float32))
            ctx_rows.append(jnp.concatenate(head_ctx, axis=-1))  # (S, H)
        ctx = jnp.concatenate(ctx_rows, axis=0)                  # (B*S, H)

        # attention output dense + residual + LayerNorm
        attn = jnp.dot(_bf16(ctx), wo_ref[layer],
                       preferred_element_type=jnp.float32) + bo_ref[layer]
        h = _layernorm(attn + h, ln1g_ref[layer], ln1b_ref[layer], eps)

        # feed-forward: dense + GELU + dense + residual + LayerNorm
        ffn = jnp.dot(_bf16(h), w1_ref[layer],
                      preferred_element_type=jnp.float32) + b1_ref[layer]
        ffn = _gelu(ffn)
        ffn = jnp.dot(_bf16(ffn), w2_ref[layer],
                      preferred_element_type=jnp.float32) + b2_ref[layer]
        h = _layernorm(ffn + h, ln2g_ref[layer], ln2b_ref[layer], eps)

    # ---- CLS pooler (dense + tanh) fused with the text projection matmul ----
    cls = jnp.concatenate([h[b * seq:b * seq + 1, :] for b in range(batch)], axis=0)  # (B, H)
    pooled = jnp.tanh(
        jnp.dot(_bf16(cls), pool_w_ref[...], preferred_element_type=jnp.float32)
        + pool_b_ref[...]
    )
    out_ref[...] = jnp.dot(_bf16(pooled), proj_ref[...],
                           preferred_element_type=jnp.float32)


# ------------------------------ deterministic params -------------------------------
def init_params(key):
    """Build synthetic BERT-like parameters, pre-fused/stacked for the single kernel."""
    def nrm(k, shape, std=0.02):
        return jax.random.normal(k, shape, dtype=jnp.float32) * std

    keys = iter(jax.random.split(key, 64))
    scale = 1.0 / math.sqrt(HEAD_DIM)

    wqkv, bqkv, wo, bo = [], [], [], []
    ln1g, ln1b, w1, b1, w2, b2, ln2g, ln2b = [], [], [], [], [], [], [], []
    for _ in range(NUM_LAYERS):
        q_w = nrm(next(keys), (HIDDEN, HIDDEN)) * scale   # attention scale folded in once
        k_w = nrm(next(keys), (HIDDEN, HIDDEN))
        v_w = nrm(next(keys), (HIDDEN, HIDDEN))
        wqkv.append(jnp.concatenate([q_w, k_w, v_w], axis=1))          # (H, 3H)
        bqkv.append(jnp.zeros((1, 3 * HIDDEN), jnp.float32))
        wo.append(nrm(next(keys), (HIDDEN, HIDDEN)))
        bo.append(jnp.zeros((1, HIDDEN), jnp.float32))
        ln1g.append(jnp.ones((1, HIDDEN), jnp.float32))
        ln1b.append(jnp.zeros((1, HIDDEN), jnp.float32))
        w1.append(nrm(next(keys), (HIDDEN, INTERMEDIATE)))
        b1.append(jnp.zeros((1, INTERMEDIATE), jnp.float32))
        w2.append(nrm(next(keys), (INTERMEDIATE, HIDDEN)))
        b2.append(jnp.zeros((1, HIDDEN), jnp.float32))
        ln2g.append(jnp.ones((1, HIDDEN), jnp.float32))
        ln2b.append(jnp.zeros((1, HIDDEN), jnp.float32))

    return {
        "word_emb": nrm(next(keys), (VOCAB, HIDDEN)),
        "pos_emb": nrm(next(keys), (MAX_POS, HIDDEN)),
        "type_emb": nrm(next(keys), (TYPE_VOCAB, HIDDEN)),
        "emb_ln_g": jnp.ones((1, HIDDEN), jnp.float32),
        "emb_ln_b": jnp.zeros((1, HIDDEN), jnp.float32),
        # matmul weights stored in bf16 (MXU inputs); biases/LN params stay f32.
        "wqkv": jnp.stack(wqkv).astype(jnp.bfloat16),      # (L, H, 3H)
        "bqkv": jnp.stack(bqkv),                           # (L, 1, 3H)
        "wo": jnp.stack(wo).astype(jnp.bfloat16),          # (L, H, H)
        "bo": jnp.stack(bo),                               # (L, 1, H)
        "ln1_g": jnp.stack(ln1g), "ln1_b": jnp.stack(ln1b),
        "w1": jnp.stack(w1).astype(jnp.bfloat16),          # (L, H, I)
        "b1": jnp.stack(b1),                               # (L, 1, I)
        "w2": jnp.stack(w2).astype(jnp.bfloat16),          # (L, I, H)
        "b2": jnp.stack(b2),                               # (L, 1, H)
        "ln2_g": jnp.stack(ln2g), "ln2_b": jnp.stack(ln2b),
        "pooler_w": nrm(next(keys), (HIDDEN, HIDDEN)).astype(jnp.bfloat16),
        "pooler_b": jnp.zeros((1, HIDDEN), jnp.float32),
        "text_projection": nrm(next(keys), (HIDDEN, PROJ_DIM)).astype(jnp.bfloat16),
    }


# -------------------------------- encoder forward ----------------------------------
def encode_text(params, input_ids):
    """BERT-style text tower: embeddings -> L layers -> CLS pooler -> projection.

    Everything after the embedding gather runs inside ONE Pallas kernel.
    """
    b, s = input_ids.shape
    assert s <= MAX_POS

    # TODO(synk): data-dependent embedding-table gather stays in plain JAX glue.
    word = jnp.take(params["word_emb"], input_ids.reshape(-1), axis=0)   # (B*S, H)
    pos = params["pos_emb"][:s]                                          # (S, H)
    typ = params["type_emb"][0:1]                                        # (1, H)  token_type_ids == 0

    kernel = functools.partial(
        _encoder_kernel,
        batch=b, seq=s, num_layers=NUM_LAYERS,
        num_heads=NUM_HEADS, head_dim=HEAD_DIM, eps=LN_EPS,
    )
    return pl.pallas_call(
        kernel,
        out_shape=jax.ShapeDtypeStruct((b, PROJ_DIM), jnp.float32),
        in_specs=[_VMEM_SPEC] * 20,
        out_specs=_VMEM_SPEC,
    )(
        word, pos, typ, params["emb_ln_g"], params["emb_ln_b"],
        params["wqkv"], params["bqkv"], params["wo"], params["bo"],
        params["ln1_g"], params["ln1_b"],
        params["w1"], params["b1"], params["w2"], params["b2"],
        params["ln2_g"], params["ln2_b"],
        params["pooler_w"], params["pooler_b"], params["text_projection"],
    )


class PmcClipTextPallas:
    """Pallas/JAX equivalent of PmcClipText.forward (synthetic deterministic weights)."""

    def __init__(self, params, modality="text"):
        self.params = params
        self.modality = modality

    def __call__(self, inputs):
        if self.modality == "patient":
            return {
                "patient_q": encode_text(self.params, inputs["patient_q"]),
                "patient_t": encode_text(self.params, inputs["patient_t"]),
            }
        return (encode_text(self.params, inputs[self.modality]),)


# -------------------------------------- main ---------------------------------------
if __name__ == "__main__":
    key = jax.random.PRNGKey(0)
    k_params, k_ids = jax.random.split(key)

    params = init_params(k_params)
    model = PmcClipTextPallas(params, modality="text")

    batch, seq = 2, 8
    input_ids = jax.random.randint(k_ids, (batch, seq), 0, VOCAB, dtype=jnp.int32)

    (features,) = model({"text": input_ids})
    features = jax.block_until_ready(features)

    assert features.shape == (batch, PROJ_DIM)
    assert features.dtype == jnp.float32
    assert bool(jnp.all(jnp.isfinite(features)))
    print("KERNEL_OK")
</pallas_src>

<mosaic_0001>
module attributes {stable_mosaic.version = 11 : i64} {
  func.func @_encoder_kernel(%arg0: memref<16x32xf32, #tpu.memory_space<vmem>>, %arg1: memref<8x32xf32, #tpu.memory_space<vmem>>, %arg2: memref<1x32xf32, #tpu.memory_space<vmem>>, %arg3: memref<1x32xf32, #tpu.memory_space<vmem>>, %arg4: memref<1x32xf32, #tpu.memory_space<vmem>>, %arg5: memref<2x32x96xbf16, #tpu.memory_space<vmem>>, %arg6: memref<2x1x96xf32, #tpu.memory_space<vmem>>, %arg7: memref<2x32x32xbf16, #tpu.memory_space<vmem>>, %arg8: memref<2x1x32xf32, #tpu.memory_space<vmem>>, %arg9: memref<2x1x32xf32, #tpu.memory_space<vmem>>, %arg10: memref<2x1x32xf32, #tpu.memory_space<vmem>>, %arg11: memref<2x32x64xbf16, #tpu.memory_space<vmem>>, %arg12: memref<2x1x64xf32, #tpu.memory_space<vmem>>, %arg13: memref<2x64x32xbf16, #tpu.memory_space<vmem>>, %arg14: memref<2x1x32xf32, #tpu.memory_space<vmem>>, %arg15: memref<2x1x32xf32, #tpu.memory_space<vmem>>, %arg16: memref<2x1x32xf32, #tpu.memory_space<vmem>>, %arg17: memref<32x32xbf16, #tpu.memory_space<vmem>>, %arg18: memref<1x32xf32, #tpu.memory_space<vmem>>, %arg19: memref<32x16xbf16, #tpu.memory_space<vmem>>, %arg20: memref<2x16xf32, #tpu.memory_space<vmem>>) attributes {dimension_semantics = [], scalar_prefetch = 0 : i64, scratch_operands = 0 : i64, tpu.core_type = #tpu.core_type<tc>} {
    %c0 = arith.constant 0 : index
    %c0_0 = arith.constant 0 : index
    %0 = vector.load %arg1[%c0, %c0_0] : memref<8x32xf32, #tpu.memory_space<vmem>>, vector<8x32xf32>
    %1 = tpu.concatenate %0, %0 in 0 : vector<8x32xf32>, vector<8x32xf32> -> vector<16x32xf32>
    %c0_1 = arith.constant 0 : index
    %c0_2 = arith.constant 0 : index
    %2 = vector.load %arg0[%c0_1, %c0_2] : memref<16x32xf32, #tpu.memory_space<vmem>>, vector<16x32xf32>
    %3 = arith.addf %2, %1 : vector<16x32xf32>
    %c0_3 = arith.constant 0 : index
    %c0_4 = arith.constant 0 : index
    %4 = vector.load %arg2[%c0_3, %c0_4] : memref<1x32xf32, #tpu.memory_space<vmem>>, vector<1x32xf32>
    %5 = vector.broadcast %4 : vector<1x32xf32> to vector<16x32xf32>
    %6 = arith.addf %3, %5 : vector<16x32xf32>
    %c0_5 = arith.constant 0 : index
    %c0_6 = arith.constant 0 : index
    %7 = vector.load %arg3[%c0_5, %c0_6] : memref<1x32xf32, #tpu.memory_space<vmem>>, vector<1x32xf32>
    %c0_7 = arith.constant 0 : index
    %c0_8 = arith.constant 0 : index
    %8 = vector.load %arg4[%c0_7, %c0_8] : memref<1x32xf32, #tpu.memory_space<vmem>>, vector<1x32xf32>
    %cst = arith.constant dense<0.000000e+00> : vector<16xf32>
    %9 = vector.multi_reduction <add>, %6, %cst [1] : vector<16x32xf32> to vector<16xf32>
    %10 = vector.shape_cast %9 : vector<16xf32> to vector<16x1xf32>
    %cst_9 = arith.constant 3.200000e+01 : f32
    %11 = vector.broadcast %cst_9 : f32 to vector<16x1xf32>
    %12 = arith.divf %10, %11 : vector<16x1xf32>
    %13 = vector.broadcast %12 : vector<16x1xf32> to vector<16x32xf32>
    %14 = arith.subf %6, %13 : vector<16x32xf32>
    %15 = arith.mulf %14, %14 : vector<16x32xf32>
    %cst_10 = arith.constant dense<0.000000e+00> : vector<16xf32>
    %16 = vector.multi_reduction <add>, %15, %cst_10 [1] : vector<16x32xf32> to vector<16xf32>
    %17 = vector.shape_cast %16 : vector<16xf32> to vector<16x1xf32>
    %cst_11 = arith.constant 3.200000e+01 : f32
    %18 = vector.broadcast %cst_11 : f32 to vector<16x1xf32>
    %19 = arith.divf %17, %18 : vector<16x1xf32>
    %cst_12 = arith.constant 9.99999996E-13 : f32
    %20 = vector.broadcast %cst_12 : f32 to vector<16x1xf32>
    %21 = arith.addf %19, %20 : vector<16x1xf32>
    %22 = math.rsqrt %21 : vector<16x1xf32>
    %23 = vector.broadcast %22 : vector<16x1xf32> to vector<16x32xf32>
    %24 = arith.mulf %14, %23 : vector<16x32xf32>
    %25 = vector.broadcast %7 : vector<1x32xf32> to vector<16x32xf32>
    %26 = arith.mulf %24, %25 : vector<16x32xf32>
    %27 = vector.broadcast %8 : vector<1x32xf32> to vector<16x32xf32>
    %28 = arith.addf %26, %27 : vector<16x32xf32>
    %29 = arith.truncf %28 : vector<16x32xf32> to vector<16x32xbf16>
    %c0_13 = arith.constant 0 : index
    %c0_14 = arith.constant 0 : index
    %c0_15 = arith.constant 0 : index
    %30 = vector.load %arg5[%c0_13, %c0_14, %c0_15] : memref<2x32x96xbf16, #tpu.memory_space<vmem>>, vector<1x32x96xbf16>
    %31 = vector.shape_cast %30 : vector<1x32x96xbf16> to vector<32x96xbf16>
    %cst_16 = arith.constant dense<0.000000e+00> : vector<16x96xf32>
    %32 = tpu.matmul %29, %31, %cst_16 {dimension_numbers = #tpu.dot_dimension_numbers<[1], [0], [0], [1], [0, 0, 1, 1], [], []>} : vector<16x32xbf16>, vector<32x96xbf16>, vector<16x96xf32> -> vector<16x96xf32>
    %c0_17 = arith.constant 0 : index
    %c0_18 = arith.constant 0 : index
    %c0_19 = arith.constant 0 : index
    %33 = vector.load %arg6[%c0_17, %c0_18, %c0_19] : memref<2x1x96xf32, #tpu.memory_space<vmem>>, vector<1x1x96xf32>
    %34 = vector.shape_cast %33 : vector<1x1x96xf32> to vector<1x96xf32>
    %35 = vector.broadcast %34 : vector<1x96xf32> to vector<16x96xf32>
    %36 = arith.addf %32, %35 : vector<16x96xf32>
    %37 = vector.extract_strided_slice %36 {offsets = [0, 0], sizes = [16, 32], strides = [1, 1]} : vector<16x96xf32> to vector<16x32xf32>
    %38 = vector.extract_strided_slice %36 {offsets = [0, 32], sizes = [16, 32], strides = [1, 1]} : vector<16x96xf32> to vector<16x32xf32>
    %39 = vector.extract_strided_slice %36 {offsets = [0, 64], sizes = [16, 32], strides = [1, 1]} : vector<16x96xf32> to vector<16x32xf32>
    %40 = vector.extract_strided_slice %37 {offsets = [0, 0], sizes = [8, 8], strides = [1, 1]} : vector<16x32xf32> to vector<8x8xf32>
    %41 = vector.extract_strided_slice %38 {offsets = [0, 0], sizes = [8, 8], strides = [1, 1]} : vector<16x32xf32> to vector<8x8xf32>
    %42 = vector.extract_strided_slice %39 {offsets = [0, 0], sizes = [8, 8], strides = [1, 1]} : vector<16x32xf32> to vector<8x8xf32>
    "tpu.trace_start"() <{level = 10 : i32, message = "qd,kd->qk"}> : () -> ()
    %cst_20 = arith.constant dense<0.000000e+00> : vector<8x8xf32>
    %43 = tpu.matmul %40, %41, %cst_20 {dimension_numbers = #tpu.dot_dimension_numbers<[1], [1], [0], [0], [0, 0, 1, 0], [], []>} : vector<8x8xf32>, vector<8x8xf32>, vector<8x8xf32> -> vector<8x8xf32>
    "tpu.trace_stop"() : () -> ()
    %cst_21 = arith.constant dense<0xFF800000> : vector<8xf32>
    %44 = vector.multi_reduction <maximumf>, %43, %cst_21 [1] : vector<8x8xf32> to vector<8xf32>
    %45 = vector.shape_cast %44 : vector<8xf32> to vector<8x1xf32>
    %46 = vector.broadcast %45 : vector<8x1xf32> to vector<8x8xf32>
    %47 = arith.subf %43, %46 : vector<8x8xf32>
    %48 = math.exp %47 : vector<8x8xf32>
    %cst_22 = arith.constant dense<0.000000e+00> : vector<8xf32>
    %49 = vector.multi_reduction <add>, %48, %cst_22 [1] : vector<8x8xf32> to vector<8xf32>
    %50 = vector.shape_cast %49 : vector<8xf32> to vector<8x1xf32>
    %51 = tpu.reciprocal %50 {approx = true} : vector<8x1xf32> -> vector<8x1xf32>
    %52 = vector.broadcast %51 : vector<8x1xf32> to vector<8x8xf32>
    %53 = arith.mulf %48, %52 : vector<8x8xf32>
    %cst_23 = arith.constant dense<0.000000e+00> : vector<8x8xf32>
    %54 = tpu.matmul %53, %42, %cst_23 {dimension_numbers = #tpu.dot_dimension_numbers<[1], [0], [0], [1], [0, 0, 1, 1], [], []>} : vector<8x8xf32>, vector<8x8xf32>, vector<8x8xf32> -> vector<8x8xf32>
    %55 = vector.extract_strided_slice %37 {offsets = [0, 8], sizes = [8, 8], strides = [1, 1]} : vector<16x32xf32> to vector<8x8xf32>
    %56 = vector.extract_strided_slice %38 {offsets = [0, 8], sizes = [8, 8], strides = [1, 1]} : vector<16x32xf32> to vector<8x8xf32>
    %57 = vector.extract_strided_slice %39 {offsets = [0, 8], sizes = [8, 8], strides = [1, 1]} : vector<16x32xf32> to vector<8x8xf32>
    "tpu.trace_start"() <{level = 10 : i32, message = "qd,kd->qk"}> : () -> ()
    %cst_24 = arith.constant dense<0.000000e+00> : vector<8x8xf32>
    %58 = tpu.matmul %55, %56, %cst_24 {dimension_numbers = #tpu.dot_dimension_numbers<[1], [1], [0], [0], [0, 0, 1, 0], [], []>} : vector<8x8xf32>, vector<8x8xf32>, vector<8x8xf32> -> vector<8x8xf32>
    "tpu.trace_stop"() : () -> ()
    %cst_25 = arith.constant dense<0xFF800000> : vector<8xf32>
    %59 = vector.multi_reduction <maximumf>, %58, %cst_25 [1] : vector<8x8xf32> to vector<8xf32>
    %60 = vector.shape_cast %59 : vector<8xf32> to vector<8x1xf32>
    %61 = vector.broadcast %60 : vector<8x1xf32> to vector<8x8xf32>
    %62 = arith.subf %58, %61 : vector<8x8xf32>
    %63 = math.exp %62 : vector<8x8xf32>
    %cst_26 = arith.constant dense<0.000000e+00> : vector<8xf32>
    %64 = vector.multi_reduction <add>, %63, %cst_26 [1] : vector<8x8xf32> to vector<8xf32>
    %65 = vector.shape_cast %64 : vector<8xf32> to vector<8x1xf32>
    %66 = tpu.reciprocal %65 {approx = true} : vector<8x1xf32> -> vector<8x1xf32>
    %67 = vector.broadcast %66 : vector<8x1xf32> to vector<8x8xf32>
    %68 = arith.mulf %63, %67 : vector<8x8xf32>
    %cst_27 = arith.constant dense<0.000000e+00> : vector<8x8xf32>
    %69 = tpu.matmul %68, %57, %cst_27 {dimension_numbers = #tpu.dot_dimension_numbers<[1], [0], [0], [1], [0, 0, 1, 1], [], []>} : vector<8x8xf32>, vector<8x8xf32>, vector<8x8xf32> -> vector<8x8xf32>
    %70 = vector.extract_strided_slice %37 {offsets = [0, 16], sizes = [8, 8], strides = [1, 1]} : vector<16x32xf32> to vector<8x8xf32>
    %71 = vector.extract_strided_slice %38 {offsets = [0, 16], sizes = [8, 8], strides = [1, 1]} : vector<16x32xf32> to vector<8x8xf32>
    %72 = vector.extract_strided_slice %39 {offsets = [0, 16], sizes = [8, 8], strides = [1, 1]} : vector<16x32xf32> to vector<8x8xf32>
    "tpu.trace_start"() <{level = 10 : i32, message = "qd,kd->qk"}> : () -> ()
    %cst_28 = arith.constant dense<0.000000e+00> : vector<8x8xf32>
    %73 = tpu.matmul %70, %71, %cst_28 {dimension_numbers = #tpu.dot_dimension_numbers<[1], [1], [0], [0], [0, 0, 1, 0], [], []>} : vector<8x8xf32>, vector<8x8xf32>, vector<8x8xf32> -> vector<8x8xf32>
    "tpu.trace_stop"() : () -> ()
    %cst_29 = arith.constant dense<0xFF800000> : vector<8xf32>
    %74 = vector.multi_reduction <maximumf>, %73, %cst_29 [1] : vector<8x8xf32> to vector<8xf32>
    %75 = vector.shape_cast %74 : vector<8xf32> to vector<8x1xf32>
    %76 = vector.broadcast %75 : vector<8x1xf32> to vector<8x8xf32>
    %77 = arith.subf %73, %76 : vector<8x8xf32>
    %78 = math.exp %77 : vector<8x8xf32>
    %cst_30 = arith.constant dense<0.000000e+00> : vector<8xf32>
    %79 = vector.multi_reduction <add>, %78, %cst_30 [1] : vector<8x8xf32> to vector<8xf32>
    %80 = vector.shape_cast %79 : vector<8xf32> to vector<8x1xf32>
    %81 = tpu.reciprocal %80 {approx = true} : vector<8x1xf32> -> vector<8x1xf32>
    %82 = vector.broadcast %81 : vector<8x1xf32> to vector<8x8xf32>
    %83 = arith.mulf %78, %82 : vector<8x8xf32>
    %cst_31 = arith.constant dense<0.000000e+00> : vector<8x8xf32>
    %84 = tpu.matmul %83, %72, %cst_31 {dimension_numbers = #tpu.dot_dimension_numbers<[1], [0], [0], [1], [0, 0, 1, 1], [], []>} : vector<8x8xf32>, vector<8x8xf32>, vector<8x8xf32> -> vector<8x8xf32>
    %85 = vector.extract_strided_slice %37 {offsets = [0, 24], sizes = [8, 8], strides = [1, 1]} : vector<16x32xf32> to vector<8x8xf32>
    %86 = vector.extract_strided_slice %38 {offsets = [0, 24], sizes = [8, 8], strides = [1, 1]} : vector<16x32xf32> to vector<8x8xf32>
    %87 = vector.extract_strided_slice %39 {offsets = [0, 24], sizes = [8, 8], strides = [1, 1]} : vector<16x32xf32> to vector<8x8xf32>
    "tpu.trace_start"() <{level = 10 : i32, message = "qd,kd->qk"}> : () -> ()
    %cst_32 = arith.constant dense<0.000000e+00> : vector<8x8xf32>
    %88 = tpu.matmul %85, %86, %cst_32 {dimension_numbers = #tpu.dot_dimension_numbers<[1], [1], [0], [0], [0, 0, 1, 0], [], []>} : vector<8x8xf32>, vector<8x8xf32>, vector<8x8xf32> -> vector<8x8xf32>
    "tpu.trace_stop"() : () -> ()
    %cst_33 = arith.constant dense<0xFF800000> : vector<8xf32>
    %89 = vector.multi_reduction <maximumf>, %88, %cst_33 [1] : vector<8x8xf32> to vector<8xf32>
    %90 = vector.shape_cast %89 : vector<8xf32> to vector<8x1xf32>
    %91 = vector.broadcast %90 : vector<8x1xf32> to vector<8x8xf32>
    %92 = arith.subf %88, %91 : vector<8x8xf32>
    %93 = math.exp %92 : vector<8x8xf32>
    %cst_34 = arith.constant dense<0.000000e+00> : vector<8xf32>
    %94 = vector.multi_reduction <add>, %93, %cst_34 [1] : vector<8x8xf32> to vector<8xf32>
    %95 = vector.shape_cast %94 : vector<8xf32> to vector<8x1xf32>
    %96 = tpu.reciprocal %95 {approx = true} : vector<8x1xf32> -> vector<8x1xf32>
    %97 = vector.broadcast %96 : vector<8x1xf32> to vector<8x8xf32>
    %98 = arith.mulf %93, %97 : vector<8x8xf32>
    %cst_35 = arith.constant dense<0.000000e+00> : vector<8x8xf32>
    %99 = tpu.matmul %98, %87, %cst_35 {dimension_numbers = #tpu.dot_dimension_numbers<[1], [0], [0], [1], [0, 0, 1, 1], [], []>} : vector<8x8xf32>, vector<8x8xf32>, vector<8x8xf32> -> vector<8x8xf32>
    %100 = tpu.concatenate %54, %69, %84, %99 in 1 : vector<8x8xf32>, vector<8x8xf32>, vector<8x8xf32>, vector<8x8xf32> -> vector<8x32xf32>
    %101 = vector.extract_strided_slice %37 {offsets = [8, 0], sizes = [8, 8], strides = [1, 1]} : vector<16x32xf32> to vector<8x8xf32>
    %102 = vector.extract_strided_slice %38 {offsets = [8, 0], sizes = [8, 8], strides = [1, 1]} : vector<16x32xf32> to vector<8x8xf32>
    %103 = vector.extract_strided_slice %39 {offsets = [8, 0], sizes = [8, 8], strides = [1, 1]} : vector<16x32xf32> to vector<8x8xf32>
    "tpu.trace_start"() <{level = 10 : i32, message = "qd,kd->qk"}> : () -> ()
    %cst_36 = arith.constant dense<0.000000e+00> : vector<8x8xf32>
    %104 = tpu.matmul %101, %102, %cst_36 {dimension_numbers = #tpu.dot_dimension_numbers<[1], [1], [0], [0], [0, 0, 1, 0], [], []>} : vector<8x8xf32>, vector<8x8xf32>, vector<8x8xf32> -> vector<8x8xf32>
    "tpu.trace_stop"() : () -> ()
    %cst_37 = arith.constant dense<0xFF800000> : vector<8xf32>
    %105 = vector.multi_reduction <maximumf>, %104, %cst_37 [1] : vector<8x8xf32> to vector<8xf32>
    %106 = vector.shape_cast %105 : vector<8xf32> to vector<8x1xf32>
    %107 = vector.broadcast %106 : vector<8x1xf32> to vector<8x8xf32>
    %108 = arith.subf %104, %107 : vector<8x8xf32>
    %109 = math.exp %108 : vector<8x8xf32>
    %cst_38 = arith.constant dense<0.000000e+00> : vector<8xf32>
    %110 = vector.multi_reduction <add>, %109, %cst_38 [1] : vector<8x8xf32> to vector<8xf32>
    %111 = vector.shape_cast %110 : vector<8xf32> to vector<8x1xf32>
    %112 = tpu.reciprocal %111 {approx = true} : vector<8x1xf32> -> vector<8x1xf32>
    %113 = vector.broadcast %112 : vector<8x1xf32> to vector<8x8xf32>
    %114 = arith.mulf %109, %113 : vector<8x8xf32>
    %cst_39 = arith.constant dense<0.000000e+00> : vector<8x8xf32>
    %115 = tpu.matmul %114, %103, %cst_39 {dimension_numbers = #tpu.dot_dimension_numbers<[1], [0], [0], [1], [0, 0, 1, 1], [], []>} : vector<8x8xf32>, vector<8x8xf32>, vector<8x8xf32> -> vector<8x8xf32>
    %116 = vector.extract_strided_slice %37 {offsets = [8, 8], sizes = [8, 8], strides = [1, 1]} : vector<16x32xf32> to vector<8x8xf32>
    %117 = vector.extract_strided_slice %38 {offsets = [8, 8], sizes = [8, 8], strides = [1, 1]} : vector<16x32xf32> to vector<8x8xf32>
    %118 = vector.extract_strided_slice %39 {offsets = [8, 8], sizes = [8, 8], strides = [1, 1]} : vector<16x32xf32> to vector<8x8xf32>
    "tpu.trace_start"() <{level = 10 : i32, message = "qd,kd->qk"}> : () -> ()
    %cst_40 = arith.constant dense<0.000000e+00> : vector<8x8xf32>
    %119 = tpu.matmul %116, %117, %cst_40 {dimension_numbers = #tpu.dot_dimension_numbers<[1], [1], [0], [0], [0, 0, 1, 0], [], []>} : vector<8x8xf32>, vector<8x8xf32>, vector<8x8xf32> -> vector<8x8xf32>
    "tpu.trace_stop"() : () -> ()
    %cst_41 = arith.constant dense<0xFF800000> : vector<8xf32>
    %120 = vector.multi_reduction <maximumf>, %119, %cst_41 [1] : vector<8x8xf32> to vector<8xf32>
    %121 = vector.shape_cast %120 : vector<8xf32> to vector<8x1xf32>
    %122 = vector.broadcast %121 : vector<8x1xf32> to vector<8x8xf32>
    %123 = arith.subf %119, %122 : vector<8x8xf32>
    %124 = math.exp %123 : vector<8x8xf32>
    %cst_42 = arith.constant dense<0.000000e+00> : vector<8xf32>
    %125 = vector.multi_reduction <add>, %124, %cst_42 [1] : vector<8x8xf32> to vector<8xf32>
    %126 = vector.shape_cast %125 : vector<8xf32> to vector<8x1xf32>
    %127 = tpu.reciprocal %126 {approx = true} : vector<8x1xf32> -> vector<8x1xf32>
    %128 = vector.broadcast %127 : vector<8x1xf32> to vector<8x8xf32>
    %129 = arith.mulf %124, %128 : vector<8x8xf32>
    %cst_43 = arith.constant dense<0.000000e+00> : vector<8x8xf32>
    %130 = tpu.matmul %129, %118, %cst_43 {dimension_numbers = #tpu.dot_dimension_numbers<[1], [0], [0], [1], [0, 0, 1, 1], [], []>} : vector<8x8xf32>, vector<8x8xf32>, vector<8x8xf32> -> vector<8x8xf32>
    %131 = vector.extract_strided_slice %37 {offsets = [8, 16], sizes = [8, 8], strides = [1, 1]} : vector<16x32xf32> to vector<8x8xf32>
    %132 = vector.extract_strided_slice %38 {offsets = [8, 16], sizes = [8, 8], strides = [1, 1]} : vector<16x32xf32> to vector<8x8xf32>
    %133 = vector.extract_strided_slice %39 {offsets = [8, 16], sizes = [8, 8], strides = [1, 1]} : vector<16x32xf32> to vector<8x8xf32>
    "tpu.trace_start"() <{level = 10 : i32, message = "qd,kd->qk"}> : () -> ()
    %cst_44 = arith.constant dense<0.000000e+00> : vector<8x8xf32>
    %134 = tpu.matmul %131, %132, %cst_44 {dimension_numbers = #tpu.dot_dimension_numbers<[1], [1], [0], [0], [0, 0, 1, 0], [], []>} : vector<8x8xf32>, vector<8x8xf32>, vector<8x8xf32> -> vector<8x8xf32>
    "tpu.trace_stop"() : () -> ()
    %cst_45 = arith.constant dense<0xFF800000> : vector<8xf32>
    %135 = vector.multi_reduction <maximumf>, %134, %cst_45 [1] : vector<8x8xf32> to vector<8xf32>
    %136 = vector.shape_cast %135 : vector<8xf32> to vector<8x1xf32>
    %137 = vector.broadcast %136 : vector<8x1xf32> to vector<8x8xf32>
    %138 = arith.subf %134, %137 : vector<8x8xf32>
    %139 = math.exp %138 : vector<8x8xf32>
    %cst_46 = arith.constant dense<0.000000e+00> : vector<8xf32>
    %140 = vector.multi_reduction <add>, %139, %cst_46 [1] : vector<8x8xf32> to vector<8xf32>
    %141 = vector.shape_cast %140 : vector<8xf32> to vector<8x1xf32>
    %142 = tpu.reciprocal %141 {approx = true} : vector<8x1xf32> -> vector<8x1xf32>
    %143 = vector.broadcast %142 : vector<8x1xf32> to vector<8x8xf32>
    %144 = arith.mulf %139, %143 : vector<8x8xf32>
    %cst_47 = arith.constant dense<0.000000e+00> : vector<8x8xf32>
    %145 = tpu.matmul %144, %133, %cst_47 {dimension_numbers = #tpu.dot_dimension_numbers<[1], [0], [0], [1], [0, 0, 1, 1], [], []>} : vector<8x8xf32>, vector<8x8xf32>, vector<8x8xf32> -> vector<8x8xf32>
    %146 = vector.extract_strided_slice %37 {offsets = [8, 24], sizes = [8, 8], strides = [1, 1]} : vector<16x32xf32> to vector<8x8xf32>
    %147 = vector.extract_strided_slice %38 {offsets = [8, 24], sizes = [8, 8], strides = [1, 1]} : vector<16x32xf32> to vector<8x8xf32>
    %148 = vector.extract_strided_slice %39 {offsets = [8, 24], sizes = [8, 8], strides = [1, 1]} : vector<16x32xf32> to vector<8x8xf32>
    "tpu.trace_start"() <{level = 10 : i32, message = "qd,kd->qk"}> : () -> ()
    %cst_48 = arith.constant dense<0.000000e+00> : vector<8x8xf32>
    %149 = tpu.matmul %146, %147, %cst_48 {dimension_numbers = #tpu.dot_dimension_numbers<[1], [1], [0], [0], [0, 0, 1, 0], [], []>} : vector<8x8xf32>, vector<8x8xf32>, vector<8x8xf32> -> vector<8x8xf32>
    "tpu.trace_stop"() : () -> ()
    %cst_49 = arith.constant dense<0xFF800000> : vector<8xf32>
    %150 = vector.multi_reduction <maximumf>, %149, %cst_49 [1] : vector<8x8xf32> to vector<8xf32>
    %151 = vector.shape_cast %150 : vector<8xf32> to vector<8x1xf32>
    %152 = vector.broadcast %151 : vector<8x1xf32> to vector<8x8xf32>
    %153 = arith.subf %149, %152 : vector<8x8xf32>
    %154 = math.exp %153 : vector<8x8xf32>
    %cst_50 = arith.constant dense<0.000000e+00> : vector<8xf32>
    %155 = vector.multi_reduction <add>, %154, %cst_50 [1] : vector<8x8xf32> to vector<8xf32>
    %156 = vector.shape_cast %155 : vector<8xf32> to vector<8x1xf32>
    %157 = tpu.reciprocal %156 {approx = true} : vector<8x1xf32> -> vector<8x1xf32>
    %158 = vector.broadcast %157 : vector<8x1xf32> to vector<8x8xf32>
    %159 = arith.mulf %154, %158 : vector<8x8xf32>
    %cst_51 = arith.constant dense<0.000000e+00> : vector<8x8xf32>
    %160 = tpu.matmul %159, %148, %cst_51 {dimension_numbers = #tpu.dot_dimension_numbers<[1], [0], [0], [1], [0, 0, 1, 1], [], []>} : vector<8x8xf32>, vector<8x8xf32>, vector<8x8xf32> -> vector<8x8xf32>
    %161 = tpu.concatenate %115, %130, %145, %160 in 1 : vector<8x8xf32>, vector<8x8xf32>, vector<8x8xf32>, vector<8x8xf32> -> vector<8x32xf32>
    %162 = tpu.concatenate %100, %161 in 0 : vector<8x32xf32>, vector<8x32xf32> -> vector<16x32xf32>
    %163 = arith.truncf %162 : vector<16x32xf32> to vector<16x32xbf16>
    %c0_52 = arith.constant 0 : index
    %c0_53 = arith.constant 0 : index
    %c0_54 = arith.constant 0 : index
    %164 = vector.load %arg7[%c0_52, %c0_53, %c0_54] : memref<2x32x32xbf16, #tpu.memory_space<vmem>>, vector<1x32x32xbf16>
    %165 = vector.shape_cast %164 : vector<1x32x32xbf16> to vector<32x32xbf16>
    %cst_55 = arith.constant dense<0.000000e+00> : vector<16x32xf32>
    %166 = tpu.matmul %163, %165, %cst_55 {dimension_numbers = #tpu.dot_dimension_numbers<[1], [0], [0], [1], [0, 0, 1, 1], [], []>} : vector<16x32xbf16>, vector<32x32xbf16>, vector<16x32xf32> -> vector<16x32xf32>
    %c0_56 = arith.constant 0 : index
    %c0_57 = arith.constant 0 : index
    %c0_58 = arith.constant 0 : index
    %167 = vector.load %arg8[%c0_56, %c0_57, %c0_58] : memref<2x1x32xf32, #tpu.memory_space<vmem>>, vector<1x1x32xf32>
    %168 = vector.shape_cast %167 : vector<1x1x32xf32> to vector<1x32xf32>
    %169 = vector.broadcast %168 : vector<1x32xf32> to vector<16x32xf32>
    %170 = arith.addf %166, %169 : vector<16x32xf32>
    %171 = arith.addf %170, %28 : vector<16x32xf32>
    %c0_59 = arith.constant 0 : index
    %c0_60 = arith.constant 0 : index
    %c0_61 = arith.constant 0 : index
    %172 = vector.load %arg9[%c0_59, %c0_60, %c0_61] : memref<2x1x32xf32, #tpu.memory_space<vmem>>, vector<1x1x32xf32>
    %173 = vector.shape_cast %172 : vector<1x1x32xf32> to vector<1x32xf32>
    %c0_62 = arith.constant 0 : index
    %c0_63 = arith.constant 0 : index
    %c0_64 = arith.constant 0 : index
    %174 = vector.load %arg10[%c0_62, %c0_63, %c0_64] : memref<2x1x32xf32, #tpu.memory_space<vmem>>, vector<1x1x32xf32>
    %175 = vector.shape_cast %174 : vector<1x1x32xf32> to vector<1x32xf32>
    %cst_65 = arith.constant dense<0.000000e+00> : vector<16xf32>
    %176 = vector.multi_reduction <add>, %171, %cst_65 [1] : vector<16x32xf32> to vector<16xf32>
    %177 = vector.shape_cast %176 : vector<16xf32> to vector<16x1xf32>
    %cst_66 = arith.constant 3.200000e+01 : f32
    %178 = vector.broadcast %cst_66 : f32 to vector<16x1xf32>
    %179 = arith.divf %177, %178 : vector<16x1xf32>
    %180 = vector.broadcast %179 : vector<16x1xf32> to vector<16x32xf32>
    %181 = arith.subf %171, %180 : vector<16x32xf32>
    %182 = arith.mulf %181, %181 : vector<16x32xf32>
    %cst_67 = arith.constant dense<0.000000e+00> : vector<16xf32>
    %183 = vector.multi_reduction <add>, %182, %cst_67 [1] : vector<16x32xf32> to vector<16xf32>
    %184 = vector.shape_cast %183 : vector<16xf32> to vector<16x1xf32>
    %cst_68 = arith.constant 3.200000e+01 : f32
    %185 = vector.broadcast %cst_68 : f32 to vector<16x1xf32>
    %186 = arith.divf %184, %185 : vector<16x1xf32>
    %cst_69 = arith.constant 9.99999996E-13 : f32
    %187 = vector.broadcast %cst_69 : f32 to vector<16x1xf32>
    %188 = arith.addf %186, %187 : vector<16x1xf32>
    %189 = math.rsqrt %188 : vector<16x1xf32>
    %190 = vector.broadcast %189 : vector<16x1xf32> to vector<16x32xf32>
    %191 = arith.mulf %181, %190 : vector<16x32xf32>
    %192 = vector.broadcast %173 : vector<1x32xf32> to vector<16x32xf32>
    %193 = arith.mulf %191, %192 : vector<16x32xf32>
    %194 = vector.broadcast %175 : vector<1x32xf32> to vector<16x32xf32>
    %195 = arith.addf %193, %194 : vector<16x32xf32>
    %196 = arith.truncf %195 : vector<16x32xf32> to vector<16x32xbf16>
    %c0_70 = arith.constant 0 : index
    %c0_71 = arith.constant 0 : index
    %c0_72 = arith.constant 0 : index
    %197 = vector.load %arg11[%c0_70, %c0_71, %c0_72] : memref<2x32x64xbf16, #tpu.memory_space<vmem>>, vector<1x32x64xbf16>
    %198 = vector.shape_cast %197 : vector<1x32x64xbf16> to vector<32x64xbf16>
    %cst_73 = arith.constant dense<0.000000e+00> : vector<16x64xf32>
    %199 = tpu.matmul %196, %198, %cst_73 {dimension_numbers = #tpu.dot_dimension_numbers<[1], [0], [0], [1], [0, 0, 1, 1], [], []>} : vector<16x32xbf16>, vector<32x64xbf16>, vector<16x64xf32> -> vector<16x64xf32>
    %c0_74 = arith.constant 0 : index
    %c0_75 = arith.constant 0 : index
    %c0_76 = arith.constant 0 : index
    %200 = vector.load %arg12[%c0_74, %c0_75, %c0_76] : memref<2x1x64xf32, #tpu.memory_space<vmem>>, vector<1x1x64xf32>
    %201 = vector.shape_cast %200 : vector<1x1x64xf32> to vector<1x64xf32>
    %202 = vector.broadcast %201 : vector<1x64xf32> to vector<16x64xf32>
    %203 = arith.addf %199, %202 : vector<16x64xf32>
    %cst_77 = arith.constant 5.000000e-01 : f32
    %204 = vector.broadcast %cst_77 : f32 to vector<16x64xf32>
    %205 = arith.mulf %204, %203 : vector<16x64xf32>
    %cst_78 = arith.constant 4.471500e-02 : f32
    %206 = vector.broadcast %cst_78 : f32 to vector<16x64xf32>
    %207 = arith.mulf %206, %203 : vector<16x64xf32>
    %208 = arith.mulf %207, %203 : vector<16x64xf32>
    %209 = arith.mulf %208, %203 : vector<16x64xf32>
    %210 = arith.addf %203, %209 : vector<16x64xf32>
    %cst_79 = arith.constant 0.797884583 : f32
    %211 = vector.broadcast %cst_79 : f32 to vector<16x64xf32>
    %212 = arith.mulf %211, %210 : vector<16x64xf32>
    %213 = math.tanh %212 : vector<16x64xf32>
    %cst_80 = arith.constant 1.000000e+00 : f32
    %214 = vector.broadcast %cst_80 : f32 to vector<16x64xf32>
    %215 = arith.addf %214, %213 : vector<16x64xf32>
    %216 = arith.mulf %205, %215 : vector<16x64xf32>
    %217 = arith.truncf %216 : vector<16x64xf32> to vector<16x64xbf16>
    %c0_81 = arith.constant 0 : index
    %c0_82 = arith.constant 0 : index
    %c0_83 = arith.constant 0 : index
    %218 = vector.load %arg13[%c0_81, %c0_82, %c0_83] : memref<2x64x32xbf16, #tpu.memory_space<vmem>>, vector<1x64x32xbf16>
    %219 = vector.shape_cast %218 : vector<1x64x32xbf16> to vector<64x32xbf16>
    %cst_84 = arith.constant dense<0.000000e+00> : vector<16x32xf32>
    %220 = tpu.matmul %217, %219, %cst_84 {dimension_numbers = #tpu.dot_dimension_numbers<[1], [0], [0], [1], [0, 0, 1, 1], [], []>} : vector<16x64xbf16>, vector<64x32xbf16>, vector<16x32xf32> -> vector<16x32xf32>
    %c0_85 = arith.constant 0 : index
    %c0_86 = arith.constant 0 : index
    %c0_87 = arith.constant 0 : index
    %221 = vector.load %arg14[%c0_85, %c0_86, %c0_87] : memref<2x1x32xf32, #tpu.memory_space<vmem>>, vector<1x1x32xf32>
    %222 = vector.shape_cast %221 : vector<1x1x32xf32> to vector<1x32xf32>
    %223 = vector.broadcast %222 : vector<1x32xf32> to vector<16x32xf32>
    %224 = arith.addf %220, %223 : vector<16x32xf32>
    %225 = arith.addf %224, %195 : vector<16x32xf32>
    %c0_88 = arith.constant 0 : index
    %c0_89 = arith.constant 0 : index
    %c0_90 = arith.constant 0 : index
    %226 = vector.load %arg15[%c0_88, %c0_89, %c0_90] : memref<2x1x32xf32, #tpu.memory_space<vmem>>, vector<1x1x32xf32>
    %227 = vector.shape_cast %226 : vector<1x1x32xf32> to vector<1x32xf32>
    %c0_91 = arith.constant 0 : index
    %c0_92 = arith.constant 0 : index
    %c0_93 = arith.constant 0 : index
    %228 = vector.load %arg16[%c0_91, %c0_92, %c0_93] : memref<2x1x32xf32, #tpu.memory_space<vmem>>, vector<1x1x32xf32>
    %229 = vector.shape_cast %228 : vector<1x1x32xf32> to vector<1x32xf32>
    %cst_94 = arith.constant dense<0.000000e+00> : vector<16xf32>
    %230 = vector.multi_reduction <add>, %225, %cst_94 [1] : vector<16x32xf32> to vector<16xf32>
    %231 = vector.shape_cast %230 : vector<16xf32> to vector<16x1xf32>
    %cst_95 = arith.constant 3.200000e+01 : f32
    %232 = vector.broadcast %cst_95 : f32 to vector<16x1xf32>
    %233 = arith.divf %231, %232 : vector<16x1xf32>
    %234 = vector.broadcast %233 : vector<16x1xf32> to vector<16x32xf32>
    %235 = arith.subf %225, %234 : vector<16x32xf32>
    %236 = arith.mulf %235, %235 : vector<16x32xf32>
    %cst_96 = arith.constant dense<0.000000e+00> : vector<16xf32>
    %237 = vector.multi_reduction <add>, %236, %cst_96 [1] : vector<16x32xf32> to vector<16xf32>
    %238 = vector.shape_cast %237 : vector<16xf32> to vector<16x1xf32>
    %cst_97 = arith.constant 3.200000e+01 : f32
    %239 = vector.broadcast %cst_97 : f32 to vector<16x1xf32>
    %240 = arith.divf %238, %239 : vector<16x1xf32>
    %cst_98 = arith.constant 9.99999996E-13 : f32
    %241 = vector.broadcast %cst_98 : f32 to vector<16x1xf32>
    %242 = arith.addf %240, %241 : vector<16x1xf32>
    %243 = math.rsqrt %242 : vector<16x1xf32>
    %244 = vector.broadcast %243 : vector<16x1xf32> to vector<16x32xf32>
    %245 = arith.mulf %235, %244 : vector<16x32xf32>
    %246 = vector.broadcast %227 : vector<1x32xf32> to vector<16x32xf32>
    %247 = arith.mulf %245, %246 : vector<16x32xf32>
    %248 = vector.broadcast %229 : vector<1x32xf32> to vector<16x32xf32>
    %249 = arith.addf %247, %248 : vector<16x32xf32>
    %250 = arith.truncf %249 : vector<16x32xf32> to vector<16x32xbf16>
    %c1 = arith.constant 1 : index
    %c0_99 = arith.constant 0 : index
    %c0_100 = arith.constant 0 : index
    %251 = vector.load %arg5[%c1, %c0_99, %c0_100] : memref<2x32x96xbf16, #tpu.memory_space<vmem>>, vector<1x32x96xbf16>
    %252 = vector.shape_cast %251 : vector<1x32x96xbf16> to vector<32x96xbf16>
    %cst_101 = arith.constant dense<0.000000e+00> : vector<16x96xf32>
    %253 = tpu.matmul %250, %252, %cst_101 {dimension_numbers = #tpu.dot_dimension_numbers<[1], [0], [0], [1], [0, 0, 1, 1], [], []>} : vector<16x32xbf16>, vector<32x96xbf16>, vector<16x96xf32> -> vector<16x96xf32>
    %c1_102 = arith.constant 1 : index
    %c0_103 = arith.constant 0 : index
    %c0_104 = arith.constant 0 : index
    %254 = vector.load %arg6[%c1_102, %c0_103, %c0_104] : memref<2x1x96xf32, #tpu.memory_space<vmem>>, vector<1x1x96xf32>
    %255 = vector.shape_cast %254 : vector<1x1x96xf32> to vector<1x96xf32>
    %256 = vector.broadcast %255 : vector<1x96xf32> to vector<16x96xf32>
    %257 = arith.addf %253, %256 : vector<16x96xf32>
    %258 = vector.extract_strided_slice %257 {offsets = [0, 0], sizes = [16, 32], strides = [1, 1]} : vector<16x96xf32> to vector<16x32xf32>
    %259 = vector.extract_strided_slice %257 {offsets = [0, 32], sizes = [16, 32], strides = [1, 1]} : vector<16x96xf32> to vector<16x32xf32>
    %260 = vector.extract_strided_slice %257 {offsets = [0, 64], sizes = [16, 32], strides = [1, 1]} : vector<16x96xf32> to vector<16x32xf32>
    %261 = vector.extract_strided_slice %258 {offsets = [0, 0], sizes = [8, 8], strides = [1, 1]} : vector<16x32xf32> to vector<8x8xf32>
    %262 = vector.extract_strided_slice %259 {offsets = [0, 0], sizes = [8, 8], strides = [1, 1]} : vector<16x32xf32> to vector<8x8xf32>
    %263 = vector.extract_strided_slice %260 {offsets = [0, 0], sizes = [8, 8], strides = [1, 1]} : vector<16x32xf32> to vector<8x8xf32>
    "tpu.trace_start"() <{level = 10 : i32, message = "qd,kd->qk"}> : () -> ()
    %cst_105 = arith.constant dense<0.000000e+00> : vector<8x8xf32>
    %264 = tpu.matmul %261, %262, %cst_105 {dimension_numbers = #tpu.dot_dimension_numbers<[1], [1], [0], [0], [0, 0, 1, 0], [], []>} : vector<8x8xf32>, vector<8x8xf32>, vector<8x8xf32> -> vector<8x8xf32>
    "tpu.trace_stop"() : () -> ()
    %cst_106 = arith.constant dense<0xFF800000> : vector<8xf32>
    %265 = vector.multi_reduction <maximumf>, %264, %cst_106 [1] : vector<8x8xf32> to vector<8xf32>
    %266 = vector.shape_cast %265 : vector<8xf32> to vector<8x1xf32>
    %267 = vector.broadcast %266 : vector<8x1xf32> to vector<8x8xf32>
    %268 = arith.subf %264, %267 : vector<8x8xf32>
    %269 = math.exp %268 : vector<8x8xf32>
    %cst_107 = arith.constant dense<0.000000e+00> : vector<8xf32>
    %270 = vector.multi_reduction <add>, %269, %cst_107 [1] : vector<8x8xf32> to vector<8xf32>
    %271 = vector.shape_cast %270 : vector<8xf32> to vector<8x1xf32>
    %272 = tpu.reciprocal %271 {approx = true} : vector<8x1xf32> -> vector<8x1xf32>
    %273 = vector.broadcast %272 : vector<8x1xf32> to vector<8x8xf32>
    %274 = arith.mulf %269, %273 : vector<8x8xf32>
    %cst_108 = arith.constant dense<0.000000e+00> : vector<8x8xf32>
    %275 = tpu.matmul %274, %263, %cst_108 {dimension_numbers = #tpu.dot_dimension_numbers<[1], [0], [0], [1], [0, 0, 1, 1], [], []>} : vector<8x8xf32>, vector<8x8xf32>, vector<8x8xf32> -> vector<8x8xf32>
    %276 = vector.extract_strided_slice %258 {offsets = [0, 8], sizes = [8, 8], strides = [1, 1]} : vector<16x32xf32> to vector<8x8xf32>
    %277 = vector.extract_strided_slice %259 {offsets = [0, 8], sizes = [8, 8], strides = [1, 1]} : vector<16x32xf32> to vector<8x8xf32>
    %278 = vector.extract_strided_slice %260 {offsets = [0, 8], sizes = [8, 8], strides = [1, 1]} : vector<16x32xf32> to vector<8x8xf32>
    "tpu.trace_start"() <{level = 10 : i32, message = "qd,kd->qk"}> : () -> ()
    %cst_109 = arith.constant dense<0.000000e+00> : vector<8x8xf32>
    %279 = tpu.matmul %276, %277, %cst_109 {dimension_numbers = #tpu.dot_dimension_numbers<[1], [1], [0], [0], [0, 0, 1, 0], [], []>} : vector<8x8xf32>, vector<8x8xf32>, vector<8x8xf32> -> vector<8x8xf32>
    "tpu.trace_stop"() : () -> ()
    %cst_110 = arith.constant dense<0xFF800000> : vector<8xf32>
    %280 = vector.multi_reduction <maximumf>, %279, %cst_110 [1] : vector<8x8xf32> to vector<8xf32>
    %281 = vector.shape_cast %280 : vector<8xf32> to vector<8x1xf32>
    %282 = vector.broadcast %281 : vector<8x1xf32> to vector<8x8xf32>
    %283 = arith.subf %279, %282 : vector<8x8xf32>
    %284 = math.exp %283 : vector<8x8xf32>
    %cst_111 = arith.constant dense<0.000000e+00> : vector<8xf32>
    %285 = vector.multi_reduction <add>, %284, %cst_111 [1] : vector<8x8xf32> to vector<8xf32>
    %286 = vector.shape_cast %285 : vector<8xf32> to vector<8x1xf32>
    %287 = tpu.reciprocal %286 {approx = true} : vector<8x1xf32> -> vector<8x1xf32>
    %288 = vector.broadcast %287 : vector<8x1xf32> to vector<8x8xf32>
    %289 = arith.mulf %284, %288 : vector<8x8xf32>
    %cst_112 = arith.constant dense<0.000000e+00> : vector<8x8xf32>
    %290 = tpu.matmul %289, %278, %cst_112 {dimension_numbers = #tpu.dot_dimension_numbers<[1], [0], [0], [1], [0, 0, 1, 1], [], []>} : vector<8x8xf32>, vector<8x8xf32>, vector<8x8xf32> -> vector<8x8xf32>
    %291 = vector.extract_strided_slice %258 {offsets = [0, 16], sizes = [8, 8], strides = [1, 1]} : vector<16x32xf32> to vector<8x8xf32>
    %292 = vector.extract_strided_slice %259 {offsets = [0, 16], sizes = [8, 8], strides = [1, 1]} : vector<16x32xf32> to vector<8x8xf32>
    %293 = vector.extract_strided_slice %260 {offsets = [0, 16], sizes = [8, 8], strides = [1, 1]} : vector<16x32xf32> to vector<8x8xf32>
    "tpu.trace_start"() <{level = 10 : i32, message = "qd,kd->qk"}> : () -> ()
    %cst_113 = arith.constant dense<0.000000e+00> : vector<8x8xf32>
    %294 = tpu.matmul %291, %292, %cst_113 {dimension_numbers = #tpu.dot_dimension_numbers<[1], [1], [0], [0], [0, 0, 1, 0], [], []>} : vector<8x8xf32>, vector<8x8xf32>, vector<8x8xf32> -> vector<8x8xf32>
    "tpu.trace_stop"() : () -> ()
    %cst_114 = arith.constant dense<0xFF800000> : vector<8xf32>
    %295 = vector.multi_reduction <maximumf>, %294, %cst_114 [1] : vector<8x8xf32> to vector<8xf32>
    %296 = vector.shape_cast %295 : vector<8xf32> to vector<8x1xf32>
    %297 = vector.broadcast %296 : vector<8x1xf32> to vector<8x8xf32>
    %298 = arith.subf %294, %297 : vector<8x8xf32>
    %299 = math.exp %298 : vector<8x8xf32>
    %cst_115 = arith.constant dense<0.000000e+00> : vector<8xf32>
    %300 = vector.multi_reduction <add>, %299, %cst_115 [1] : vector<8x8xf32> to vector<8xf32>
    %301 = vector.shape_cast %300 : vector<8xf32> to vector<8x1xf32>
    %302 = tpu.reciprocal %301 {approx = true} : vector<8x1xf32> -> vector<8x1xf32>
    %303 = vector.broadcast %302 : vector<8x1xf32> to vector<8x8xf32>
    %304 = arith.mulf %299, %303 : vector<8x8xf32>
    %cst_116 = arith.constant dense<0.000000e+00> : vector<8x8xf32>
    %305 = tpu.matmul %304, %293, %cst_116 {dimension_numbers = #tpu.dot_dimension_numbers<[1], [0], [0], [1], [0, 0, 1, 1], [], []>} : vector<8x8xf32>, vector<8x8xf32>, vector<8x8xf32> -> vector<8x8xf32>
    %306 = vector.extract_strided_slice %258 {offsets = [0, 24], sizes = [8, 8], strides = [1, 1]} : vector<16x32xf32> to vector<8x8xf32>
    %307 = vector.extract_strided_slice %259 {offsets = [0, 24], sizes = [8, 8], strides = [1, 1]} : vector<16x32xf32> to vector<8x8xf32>
    %308 = vector.extract_strided_slice %260 {offsets = [0, 24], sizes = [8, 8], strides = [1, 1]} : vector<16x32xf32> to vector<8x8xf32>
    "tpu.trace_start"() <{level = 10 : i32, message = "qd,kd->qk"}> : () -> ()
    %cst_117 = arith.constant dense<0.000000e+00> : vector<8x8xf32>
    %309 = tpu.matmul %306, %307, %cst_117 {dimension_numbers = #tpu.dot_dimension_numbers<[1], [1], [0], [0], [0, 0, 1, 0], [], []>} : vector<8x8xf32>, vector<8x8xf32>, vector<8x8xf32> -> vector<8x8xf32>
    "tpu.trace_stop"() : () -> ()
    %cst_118 = arith.constant dense<0xFF800000> : vector<8xf32>
    %310 = vector.multi_reduction <maximumf>, %309, %cst_118 [1] : vector<8x8xf32> to vector<8xf32>
    %311 = vector.shape_cast %310 : vector<8xf32> to vector<8x1xf32>
    %312 = vector.broadcast %311 : vector<8x1xf32> to vector<8x8xf32>
    %313 = arith.subf %309, %312 : vector<8x8xf32>
    %314 = math.exp %313 : vector<8x8xf32>
    %cst_119 = arith.constant dense<0.000000e+00> : vector<8xf32>
    %315 = vector.multi_reduction <add>, %314, %cst_119 [1] : vector<8x8xf32> to vector<8xf32>
    %316 = vector.shape_cast %315 : vector<8xf32> to vector<8x1xf32>
    %317 = tpu.reciprocal %316 {approx = true} : vector<8x1xf32> -> vector<8x1xf32>
    %318 = vector.broadcast %317 : vector<8x1xf32> to vector<8x8xf32>
    %319 = arith.mulf %314, %318 : vector<8x8xf32>
    %cst_120 = arith.constant dense<0.000000e+00> : vector<8x8xf32>
    %320 = tpu.matmul %319, %308, %cst_120 {dimension_numbers = #tpu.dot_dimension_numbers<[1], [0], [0], [1], [0, 0, 1, 1], [], []>} : vector<8x8xf32>, vector<8x8xf32>, vector<8x8xf32> -> vector<8x8xf32>
    %321 = tpu.concatenate %275, %290, %305, %320 in 1 : vector<8x8xf32>, vector<8x8xf32>, vector<8x8xf32>, vector<8x8xf32> -> vector<8x32xf32>
    %322 = vector.extract_strided_slice %258 {offsets = [8, 0], sizes = [8, 8], strides = [1, 1]} : vector<16x32xf32> to vector<8x8xf32>
    %323 = vector.extract_strided_slice %259 {offsets = [8, 0], sizes = [8, 8], strides = [1, 1]} : vector<16x32xf32> to vector<8x8xf32>
    %324 = vector.extract_strided_slice %260 {offsets = [8, 0], sizes = [8, 8], strides = [1, 1]} : vector<16x32xf32> to vector<8x8xf32>
    "tpu.trace_start"() <{level = 10 : i32, message = "qd,kd->qk"}> : () -> ()
    %cst_121 = arith.constant dense<0.000000e+00> : vector<8x8xf32>
    %325 = tpu.matmul %322, %323, %cst_121 {dimension_numbers = #tpu.dot_dimension_numbers<[1], [1], [0], [0], [0, 0, 1, 0], [], []>} : vector<8x8xf32>, vector<8x8xf32>, vector<8x8xf32> -> vector<8x8xf32>
    "tpu.trace_stop"() : () -> ()
    %cst_122 = arith.constant dense<0xFF800000> : vector<8xf32>
    %326 = vector.multi_reduction <maximumf>, %325, %cst_122 [1] : vector<8x8xf32> to vector<8xf32>
    %327 = vector.shape_cast %326 : vector<8xf32> to vector<8x1xf32>
    %328 = vector.broadcast %327 : vector<8x1xf32> to vector<8x8xf32>
    %329 = arith.subf %325, %328 : vector<8x8xf32>
    %330 = math.exp %329 : vector<8x8xf32>
    %cst_123 = arith.constant dense<0.000000e+00> : vector<8xf32>
    %331 = vector.multi_reduction <add>, %330, %cst_123 [1] : vector<8x8xf32> to vector<8xf32>
    %332 = vector.shape_cast %331 : vector<8xf32> to vector<8x1xf32>
    %333 = tpu.reciprocal %332 {approx = true} : vector<8x1xf32> -> vector<8x1xf32>
    %334 = vector.broadcast %333 : vector<8x1xf32> to vector<8x8xf32>
    %335 = arith.mulf %330, %334 : vector<8x8xf32>
    %cst_124 = arith.constant dense<0.000000e+00> : vector<8x8xf32>
    %336 = tpu.matmul %335, %324, %cst_124 {dimension_numbers = #tpu.dot_dimension_numbers<[1], [0], [0], [1], [0, 0, 1, 1], [], []>} : vector<8x8xf32>, vector<8x8xf32>, vector<8x8xf32> -> vector<8x8xf32>
    %337 = vector.extract_strided_slice %258 {offsets = [8, 8], sizes = [8, 8], strides = [1, 1]} : vector<16x32xf32> to vector<8x8xf32>
    %338 = vector.extract_strided_slice %259 {offsets = [8, 8], sizes = [8, 8], strides = [1, 1]} : vector<16x32xf32> to vector<8x8xf32>
    %339 = vector.extract_strided_slice %260 {offsets = [8, 8], sizes = [8, 8], strides = [1, 1]} : vector<16x32xf32> to vector<8x8xf32>
    "tpu.trace_start"() <{level = 10 : i32, message = "qd,kd->qk"}> : () -> ()
    %cst_125 = arith.constant dense<0.000000e+00> : vector<8x8xf32>
    %340 = tpu.matmul %337, %338, %cst_125 {dimension_numbers = #tpu.dot_dimension_numbers<[1], [1], [0], [0], [0, 0, 1, 0], [], []>} : vector<8x8xf32>, vector<8x8xf32>, vector<8x8xf32> -> vector<8x8xf32>
    "tpu.trace_stop"() : () -> ()
    %cst_126 = arith.constant dense<0xFF800000> : vector<8xf32>
    %341 = vector.multi_reduction <maximumf>, %340, %cst_126 [1] : vector<8x8xf32> to vector<8xf32>
    %342 = vector.shape_cast %341 : vector<8xf32> to vector<8x1xf32>
    %343 = vector.broadcast %342 : vector<8x1xf32> to vector<8x8xf32>
    %344 = arith.subf %340, %343 : vector<8x8xf32>
    %345 = math.exp %344 : vector<8x8xf32>
    %cst_127 = arith.constant dense<0.000000e+00> : vector<8xf32>
    %346 = vector.multi_reduction <add>, %345, %cst_127 [1] : vector<8x8xf32> to vector<8xf32>
    %347 = vector.shape_cast %346 : vector<8xf32> to vector<8x1xf32>
    %348 = tpu.reciprocal %347 {approx = true} : vector<8x1xf32> -> vector<8x1xf32>
    %349 = vector.broadcast %348 : vector<8x1xf32> to vector<8x8xf32>
    %350 = arith.mulf %345, %349 : vector<8x8xf32>
    %cst_128 = arith.constant dense<0.000000e+00> : vector<8x8xf32>
    %351 = tpu.matmul %350, %339, %cst_128 {dimension_numbers = #tpu.dot_dimension_numbers<[1], [0], [0], [1], [0, 0, 1, 1], [], []>} : vector<8x8xf32>, vector<8x8xf32>, vector<8x8xf32> -> vector<8x8xf32>
    %352 = vector.extract_strided_slice %258 {offsets = [8, 16], sizes = [8, 8], strides = [1, 1]} : vector<16x32xf32> to vector<8x8xf32>
    %353 = vector.extract_strided_slice %259 {offsets = [8, 16], sizes = [8, 8], strides = [1, 1]} : vector<16x32xf32> to vector<8x8xf32>
    %354 = vector.extract_strided_slice %260 {offsets = [8, 16], sizes = [8, 8], strides = [1, 1]} : vector<16x32xf32> to vector<8x8xf32>
    "tpu.trace_start"() <{level = 10 : i32, message = "qd,kd->qk"}> : () -> ()
    %cst_129 = arith.constant dense<0.000000e+00> : vector<8x8xf32>
    %355 = tpu.matmul %352, %353, %cst_129 {dimension_numbers = #tpu.dot_dimension_numbers<[1], [1], [0], [0], [0, 0, 1, 0], [], []>} : vector<8x8xf32>, vector<8x8xf32>, vector<8x8xf32> -> vector<8x8xf32>
    "tpu.trace_stop"() : () -> ()
    %cst_130 = arith.constant dense<0xFF800000> : vector<8xf32>
    %356 = vector.multi_reduction <maximumf>, %355, %cst_130 [1] : vector<8x8xf32> to vector<8xf32>
    %357 = vector.shape_cast %356 : vector<8xf32> to vector<8x1xf32>
    %358 = vector.broadcast %357 : vector<8x1xf32> to vector<8x8xf32>
    %359 = arith.subf %355, %358 : vector<8x8xf32>
    %360 = math.exp %359 : vector<8x8xf32>
    %cst_131 = arith.constant dense<0.000000e+00> : vector<8xf32>
    %361 = vector.multi_reduction <add>, %360, %cst_131 [1] : vector<8x8xf32> to vector<8xf32>
    %362 = vector.shape_cast %361 : vector<8xf32> to vector<8x1xf32>
    %363 = tpu.reciprocal %362 {approx = true} : vector<8x1xf32> -> vector<8x1xf32>
    %364 = vector.broadcast %363 : vector<8x1xf32> to vector<8x8xf32>
    %365 = arith.mulf %360, %364 : vector<8x8xf32>
    %cst_132 = arith.constant dense<0.000000e+00> : vector<8x8xf32>
    %366 = tpu.matmul %365, %354, %cst_132 {dimension_numbers = #tpu.dot_dimension_numbers<[1], [0], [0], [1], [0, 0, 1, 1], [], []>} : vector<8x8xf32>, vector<8x8xf32>, vector<8x8xf32> -> vector<8x8xf32>
    %367 = vector.extract_strided_slice %258 {offsets = [8, 24], sizes = [8, 8], strides = [1, 1]} : vector<16x32xf32> to vector<8x8xf32>
    %368 = vector.extract_strided_slice %259 {offsets = [8, 24], sizes = [8, 8], strides = [1, 1]} : vector<16x32xf32> to vector<8x8xf32>
    %369 = vector.extract_strided_slice %260 {offsets = [8, 24], sizes = [8, 8], strides = [1, 1]} : vector<16x32xf32> to vector<8x8xf32>
    "tpu.trace_start"() <{level = 10 : i32, message = "qd,kd->qk"}> : () -> ()
    %cst_133 = arith.constant dense<0.000000e+00> : vector<8x8xf32>
    %370 = tpu.matmul %367, %368, %cst_133 {dimension_numbers = #tpu.dot_dimension_numbers<[1], [1], [0], [0], [0, 0, 1, 0], [], []>} : vector<8x8xf32>, vector<8x8xf32>, vector<8x8xf32> -> vector<8x8xf32>
    "tpu.trace_stop"() : () -> ()
    %cst_134 = arith.constant dense<0xFF800000> : vector<8xf32>
    %371 = vector.multi_reduction <maximumf>, %370, %cst_134 [1] : vector<8x8xf32> to vector<8xf32>
    %372 = vector.shape_cast %371 : vector<8xf32> to vector<8x1xf32>
    %373 = vector.broadcast %372 : vector<8x1xf32> to vector<8x8xf32>
    %374 = arith.subf %370, %373 : vector<8x8xf32>
    %375 = math.exp %374 : vector<8x8xf32>
    %cst_135 = arith.constant dense<0.000000e+00> : vector<8xf32>
    %376 = vector.multi_reduction <add>, %375, %cst_135 [1] : vector<8x8xf32> to vector<8xf32>
    %377 = vector.shape_cast %376 : vector<8xf32> to vector<8x1xf32>
    %378 = tpu.reciprocal %377 {approx = true} : vector<8x1xf32> -> vector<8x1xf32>
    %379 = vector.broadcast %378 : vector<8x1xf32> to vector<8x8xf32>
    %380 = arith.mulf %375, %379 : vector<8x8xf32>
    %cst_136 = arith.constant dense<0.000000e+00> : vector<8x8xf32>
    %381 = tpu.matmul %380, %369, %cst_136 {dimension_numbers = #tpu.dot_dimension_numbers<[1], [0], [0], [1], [0, 0, 1, 1], [], []>} : vector<8x8xf32>, vector<8x8xf32>, vector<8x8xf32> -> vector<8x8xf32>
    %382 = tpu.concatenate %336, %351, %366, %381 in 1 : vector<8x8xf32>, vector<8x8xf32>, vector<8x8xf32>, vector<8x8xf32> -> vector<8x32xf32>
    %383 = tpu.concatenate %321, %382 in 0 : vector<8x32xf32>, vector<8x32xf32> -> vector<16x32xf32>
    %384 = arith.truncf %383 : vector<16x32xf32> to vector<16x32xbf16>
    %c1_137 = arith.constant 1 : index
    %c0_138 = arith.constant 0 : index
    %c0_139 = arith.constant 0 : index
    %385 = vector.load %arg7[%c1_137, %c0_138, %c0_139] : memref<2x32x32xbf16, #tpu.memory_space<vmem>>, vector<1x32x32xbf16>
    %386 = vector.shape_cast %385 : vector<1x32x32xbf16> to vector<32x32xbf16>
    %cst_140 = arith.constant dense<0.000000e+00> : vector<16x32xf32>
    %387 = tpu.matmul %384, %386, %cst_140 {dimension_numbers = #tpu.dot_dimension_numbers<[1], [0], [0], [1], [0, 0, 1, 1], [], []>} : vector<16x32xbf16>, vector<32x32xbf16>, vector<16x32xf32> -> vector<16x32xf32>
    %c1_141 = arith.constant 1 : index
    %c0_142 = arith.constant 0 : index
    %c0_143 = arith.constant 0 : index
    %388 = vector.load %arg8[%c1_141, %c0_142, %c0_143] : memref<2x1x32xf32, #tpu.memory_space<vmem>>, vector<1x1x32xf32>
    %389 = vector.shape_cast %388 : vector<1x1x32xf32> to vector<1x32xf32>
    %390 = vector.broadcast %389 : vector<1x32xf32> to vector<16x32xf32>
    %391 = arith.addf %387, %390 : vector<16x32xf32>
    %392 = arith.addf %391, %249 : vector<16x32xf32>
    %c1_144 = arith.constant 1 : index
    %c0_145 = arith.constant 0 : index
    %c0_146 = arith.constant 0 : index
    %393 = vector.load %arg9[%c1_144, %c0_145, %c0_146] : memref<2x1x32xf32, #tpu.memory_space<vmem>>, vector<1x1x32xf32>
    %394 = vector.shape_cast %393 : vector<1x1x32xf32> to vector<1x32xf32>
    %c1_147 = arith.constant 1 : index
    %c0_148 = arith.constant 0 : index
    %c0_149 = arith.constant 0 : index
    %395 = vector.load %arg10[%c1_147, %c0_148, %c0_149] : memref<2x1x32xf32, #tpu.memory_space<vmem>>, vector<1x1x32xf32>
    %396 = vector.shape_cast %395 : vector<1x1x32xf32> to vector<1x32xf32>
    %cst_150 = arith.constant dense<0.000000e+00> : vector<16xf32>
    %397 = vector.multi_reduction <add>, %392, %cst_150 [1] : vector<16x32xf32> to vector<16xf32>
    %398 = vector.shape_cast %397 : vector<16xf32> to vector<16x1xf32>
    %cst_151 = arith.constant 3.200000e+01 : f32
    %399 = vector.broadcast %cst_151 : f32 to vector<16x1xf32>
    %400 = arith.divf %398, %399 : vector<16x1xf32>
    %401 = vector.broadcast %400 : vector<16x1xf32> to vector<16x32xf32>
    %402 = arith.subf %392, %401 : vector<16x32xf32>
    %403 = arith.mulf %402, %402 : vector<16x32xf32>
    %cst_152 = arith.constant dense<0.000000e+00> : vector<16xf32>
    %404 = vector.multi_reduction <add>, %403, %cst_152 [1] : vector<16x32xf32> to vector<16xf32>
    %405 = vector.shape_cast %404 : vector<16xf32> to vector<16x1xf32>
    %cst_153 = arith.constant 3.200000e+01 : f32
    %406 = vector.broadcast %cst_153 : f32 to vector<16x1xf32>
    %407 = arith.divf %405, %406 : vector<16x1xf32>
    %cst_154 = arith.constant 9.99999996E-13 : f32
    %408 = vector.broadcast %cst_154 : f32 to vector<16x1xf32>
    %409 = arith.addf %407, %408 : vector<16x1xf32>
    %410 = math.rsqrt %409 : vector<16x1xf32>
    %411 = vector.broadcast %410 : vector<16x1xf32> to vector<16x32xf32>
    %412 = arith.mulf %402, %411 : vector<16x32xf32>
    %413 = vector.broadcast %394 : vector<1x32xf32> to vector<16x32xf32>
    %414 = arith.mulf %412, %413 : vector<16x32xf32>
    %415 = vector.broadcast %396 : vector<1x32xf32> to vector<16x32xf32>
    %416 = arith.addf %414, %415 : vector<16x32xf32>
    %417 = arith.truncf %416 : vector<16x32xf32> to vector<16x32xbf16>
    %c1_155 = arith.constant 1 : index
    %c0_156 = arith.constant 0 : index
    %c0_157 = arith.constant 0 : index
    %418 = vector.load %arg11[%c1_155, %c0_156, %c0_157] : memref<2x32x64xbf16, #tpu.memory_space<vmem>>, vector<1x32x64xbf16>
    %419 = vector.shape_cast %418 : vector<1x32x64xbf16> to vector<32x64xbf16>
    %cst_158 = arith.constant dense<0.000000e+00> : vector<16x64xf32>
    %420 = tpu.matmul %417, %419, %cst_158 {dimension_numbers = #tpu.dot_dimension_numbers<[1], [0], [0], [1], [0, 0, 1, 1], [], []>} : vector<16x32xbf16>, vector<32x64xbf16>, vector<16x64xf32> -> vector<16x64xf32>
    %c1_159 = arith.constant 1 : index
    %c0_160 = arith.constant 0 : index
    %c0_161 = arith.constant 0 : index
    %421 = vector.load %arg12[%c1_159, %c0_160, %c0_161] : memref<2x1x64xf32, #tpu.memory_space<vmem>>, vector<1x1x64xf32>
    %422 = vector.shape_cast %421 : vector<1x1x64xf32> to vector<1x64xf32>
    %423 = vector.broadcast %422 : vector<1x64xf32> to vector<16x64xf32>
    %424 = arith.addf %420, %423 : vector<16x64xf32>
    %cst_162 = arith.constant 5.000000e-01 : f32
    %425 = vector.broadcast %cst_162 : f32 to vector<16x64xf32>
    %426 = arith.mulf %425, %424 : vector<16x64xf32>
    %cst_163 = arith.constant 4.471500e-02 : f32
    %427 = vector.broadcast %cst_163 : f32 to vector<16x64xf32>
    %428 = arith.mulf %427, %424 : vector<16x64xf32>
    %429 = arith.mulf %428, %424 : vector<16x64xf32>
    %430 = arith.mulf %429, %424 : vector<16x64xf32>
    %431 = arith.addf %424, %430 : vector<16x64xf32>
    %cst_164 = arith.constant 0.797884583 : f32
    %432 = vector.broadcast %cst_164 : f32 to vector<16x64xf32>
    %433 = arith.mulf %432, %431 : vector<16x64xf32>
    %434 = math.tanh %433 : vector<16x64xf32>
    %cst_165 = arith.constant 1.000000e+00 : f32
    %435 = vector.broadcast %cst_165 : f32 to vector<16x64xf32>
    %436 = arith.addf %435, %434 : vector<16x64xf32>
    %437 = arith.mulf %426, %436 : vector<16x64xf32>
    %438 = arith.truncf %437 : vector<16x64xf32> to vector<16x64xbf16>
    %c1_166 = arith.constant 1 : index
    %c0_167 = arith.constant 0 : index
    %c0_168 = arith.constant 0 : index
    %439 = vector.load %arg13[%c1_166, %c0_167, %c0_168] : memref<2x64x32xbf16, #tpu.memory_space<vmem>>, vector<1x64x32xbf16>
    %440 = vector.shape_cast %439 : vector<1x64x32xbf16> to vector<64x32xbf16>
    %cst_169 = arith.constant dense<0.000000e+00> : vector<16x32xf32>
    %441 = tpu.matmul %438, %440, %cst_169 {dimension_numbers = #tpu.dot_dimension_numbers<[1], [0], [0], [1], [0, 0, 1, 1], [], []>} : vector<16x64xbf16>, vector<64x32xbf16>, vector<16x32xf32> -> vector<16x32xf32>
    %c1_170 = arith.constant 1 : index
    %c0_171 = arith.constant 0 : index
    %c0_172 = arith.constant 0 : index
    %442 = vector.load %arg14[%c1_170, %c0_171, %c0_172] : memref<2x1x32xf32, #tpu.memory_space<vmem>>, vector<1x1x32xf32>
    %443 = vector.shape_cast %442 : vector<1x1x32xf32> to vector<1x32xf32>
    %444 = vector.broadcast %443 : vector<1x32xf32> to vector<16x32xf32>
    %445 = arith.addf %441, %444 : vector<16x32xf32>
    %446 = arith.addf %445, %416 : vector<16x32xf32>
    %c1_173 = arith.constant 1 : index
    %c0_174 = arith.constant 0 : index
    %c0_175 = arith.constant 0 : index
    %447 = vector.load %arg15[%c1_173, %c0_174, %c0_175] : memref<2x1x32xf32, #tpu.memory_space<vmem>>, vector<1x1x32xf32>
    %448 = vector.shape_cast %447 : vector<1x1x32xf32> to vector<1x32xf32>
    %c1_176 = arith.constant 1 : index
    %c0_177 = arith.constant 0 : index
    %c0_178 = arith.constant 0 : index
    %449 = vector.load %arg16[%c1_176, %c0_177, %c0_178] : memref<2x1x32xf32, #tpu.memory_space<vmem>>, vector<1x1x32xf32>
    %450 = vector.shape_cast %449 : vector<1x1x32xf32> to vector<1x32xf32>
    %cst_179 = arith.constant dense<0.000000e+00> : vector<16xf32>
    %451 = vector.multi_reduction <add>, %446, %cst_179 [1] : vector<16x32xf32> to vector<16xf32>
    %452 = vector.shape_cast %451 : vector<16xf32> to vector<16x1xf32>
    %cst_180 = arith.constant 3.200000e+01 : f32
    %453 = vector.broadcast %cst_180 : f32 to vector<16x1xf32>
    %454 = arith.divf %452, %453 : vector<16x1xf32>
    %455 = vector.broadcast %454 : vector<16x1xf32> to vector<16x32xf32>
    %456 = arith.subf %446, %455 : vector<16x32xf32>
    %457 = arith.mulf %456, %456 : vector<16x32xf32>
    %cst_181 = arith.constant dense<0.000000e+00> : vector<16xf32>
    %458 = vector.multi_reduction <add>, %457, %cst_181 [1] : vector<16x32xf32> to vector<16xf32>
    %459 = vector.shape_cast %458 : vector<16xf32> to vector<16x1xf32>
    %cst_182 = arith.constant 3.200000e+01 : f32
    %460 = vector.broadcast %cst_182 : f32 to vector<16x1xf32>
    %461 = arith.divf %459, %460 : vector<16x1xf32>
    %cst_183 = arith.constant 9.99999996E-13 : f32
    %462 = vector.broadcast %cst_183 : f32 to vector<16x1xf32>
    %463 = arith.addf %461, %462 : vector<16x1xf32>
    %464 = math.rsqrt %463 : vector<16x1xf32>
    %465 = vector.broadcast %464 : vector<16x1xf32> to vector<16x32xf32>
    %466 = arith.mulf %456, %465 : vector<16x32xf32>
    %467 = vector.broadcast %448 : vector<1x32xf32> to vector<16x32xf32>
    %468 = arith.mulf %466, %467 : vector<16x32xf32>
    %469 = vector.broadcast %450 : vector<1x32xf32> to vector<16x32xf32>
    %470 = arith.addf %468, %469 : vector<16x32xf32>
    %471 = vector.extract_strided_slice %470 {offsets = [0, 0], sizes = [1, 32], strides = [1, 1]} : vector<16x32xf32> to vector<1x32xf32>
    %472 = vector.extract_strided_slice %470 {offsets = [8, 0], sizes = [1, 32], strides = [1, 1]} : vector<16x32xf32> to vector<1x32xf32>
    %473 = tpu.concatenate %471, %472 in 0 : vector<1x32xf32>, vector<1x32xf32> -> vector<2x32xf32>
    %474 = arith.truncf %473 : vector<2x32xf32> to vector<2x32xbf16>
    %c0_184 = arith.constant 0 : index
    %c0_185 = arith.constant 0 : index
    %475 = vector.load %arg17[%c0_184, %c0_185] : memref<32x32xbf16, #tpu.memory_space<vmem>>, vector<32x32xbf16>
    %cst_186 = arith.constant dense<0.000000e+00> : vector<2x32xf32>
    %476 = tpu.matmul %474, %475, %cst_186 {dimension_numbers = #tpu.dot_dimension_numbers<[1], [0], [0], [1], [0, 0, 1, 1], [], []>} : vector<2x32xbf16>, vector<32x32xbf16>, vector<2x32xf32> -> vector<2x32xf32>
    %c0_187 = arith.constant 0 : index
    %c0_188 = arith.constant 0 : index
    %477 = vector.load %arg18[%c0_187, %c0_188] : memref<1x32xf32, #tpu.memory_space<vmem>>, vector<1x32xf32>
    %478 = vector.broadcast %477 : vector<1x32xf32> to vector<2x32xf32>
    %479 = arith.addf %476, %478 : vector<2x32xf32>
    %480 = math.tanh %479 : vector<2x32xf32>
    %481 = arith.truncf %480 : vector<2x32xf32> to vector<2x32xbf16>
    %c0_189 = arith.constant 0 : index
    %c0_190 = arith.constant 0 : index
    %482 = vector.load %arg19[%c0_189, %c0_190] : memref<32x16xbf16, #tpu.memory_space<vmem>>, vector<32x16xbf16>
    %cst_191 = arith.constant dense<0.000000e+00> : vector<2x16xf32>
    %483 = tpu.matmul %481, %482, %cst_191 {dimension_numbers = #tpu.dot_dimension_numbers<[1], [0], [0], [1], [0, 0, 1, 1], [], []>} : vector<2x32xbf16>, vector<32x16xbf16>, vector<2x16xf32> -> vector<2x16xf32>
    %c0_192 = arith.constant 0 : index
    %c0_193 = arith.constant 0 : index
    %484 = vector.load %arg20[%c0_192, %c0_193] : memref<2x16xf32, #tpu.memory_space<vmem>>, vector<2x16xf32>
    tpu.vector_store %arg20[%c0_192, %c0_193], %483 {strides = array<i32>} : memref<2x16xf32, #tpu.memory_space<vmem>>, vector<2x16xf32>,
    return
  }
}

</mosaic_0001>

<bundles_post_ra>
// kernel: tpu_custom_call.1
= control target key start
LH: loop header
LB: loop body
LE: loop exit
PB: predicated region body
PF: predicated region fallthrough
CT: control target
= control target key end

     0   :  { %s3489_s0 = inlined_call_operand.hbm [shape: f32[16,32], index: 0, kind: input, shape index: {}]   ;;  %s3490_s1 = inlined_call_operand.hbm [shape: f32[8,32], index: 1, kind: input, shape index: {}]   ;;  %s3491_s2 = inlined_call_operand.hbm [shape: f32[1,32], index: 2, kind: input, shape index: {}]   ;;  %s3492_s3 = inlined_call_operand.hbm [shape: f32[1,32], index: 3, kind: input, shape index: {}]   ;;  %s3493_s4 = inlined_call_operand.hbm [shape: f32[1,32], index: 4, kind: input, shape index: {}]   ;;  %s3494_s5 = inlined_call_operand.vmem [shape: bf16[2,32,96], index: 5, kind: input, shape index: {}]   ;;  %s3495_s6 = inlined_call_operand.hbm [shape: f32[2,1,96], index: 6, kind: input, shape index: {}]   ;;  %s3496_s7 = inlined_call_operand.vmem [shape: bf16[2,32,32], index: 7, kind: input, shape index: {}]   ;;  %s3497_s8 = inlined_call_operand.hbm [shape: f32[2,1,32], index: 8, kind: input, shape index: {}]   ;;  %s3498_s9 = inlined_call_operand.hbm [shape: f32[2,1,32], index: 9, kind: input, shape index: {}]   ;;  %s3499_s10 = inlined_call_operand.hbm [shape: f32[2,1,32], index: 10, kind: input, shape index: {}]   ;;  %s3500_s11 = inlined_call_operand.vmem [shape: bf16[2,32,64], index: 11, kind: input, shape index: {}]   ;;  %s3501_s12 = inlined_call_operand.hbm [shape: f32[2,1,64], index: 12, kind: input, shape index: {}]   ;;  %s3502_s13 = inlined_call_operand.vmem [shape: bf16[2,64,32], index: 13, kind: input, shape index: {}]   ;;  %s3503_s14 = inlined_call_operand.hbm [shape: f32[2,1,32], index: 14, kind: input, shape index: {}]   ;;  %s3504_s15 = inlined_call_operand.hbm [shape: f32[2,1,32], index: 15, kind: input, shape index: {}]   ;;  %s3505_s16 = inlined_call_operand.hbm [shape: f32[2,1,32], index: 16, kind: input, shape index: {}]   ;;  %s3506_s17 = inlined_call_operand.hbm [shape: bf16[32,32], index: 17, kind: input, shape index: {}]   ;;  %s3507_s18 = inlined_call_operand.vmem [shape: f32[1,32], index: 18, kind: input, shape index: {}]   ;;  %s3508_s19 = inlined_call_operand.vmem [shape: bf16[32,16], index: 19, kind: input, shape index: {}]   ;;  %s3509_s20 = inlined_call_operand.hbm [shape: f32[2,16], index: 20, kind: output, shape index: {}]  }
   0x1   :  { %3510 = sst [smem:[#allocation35_spill]] %s3489_s0 }
   0x2   :  { %3511 = sst [smem:[#allocation36_spill]] %s3490_s1 }
   0x3   :  { %3512 = sst [smem:[#allocation37_spill]] %s3491_s2 }
   0x4   :  { %3513 = sst [smem:[#allocation38_spill]] %s3492_s3 }
   0x5   :  { %3514 = sst [smem:[#allocation39_spill]] %s3493_s4 }
   0x6   :  { %3515 = sst [smem:[#allocation40_spill]] %s3509_s20 }
   0x7   :  { %25 = vsyncpa [#allocation3], 0 }
   0x8   :  { %26 = vsyncpa [#allocation6], 0 }
   0x9   :  { %27 = vsyncpa [#allocation9], 0 }
   0xa   :  { %28 = vsyncpa [#allocation12], 0 }
   0xb   :  { %29 = vsyncpa [#allocation15], 0 }
   0xc   :  { %30 = vsyncpa [#allocation18], 0 }
   0xd   :  { %31 = vsyncpa [#allocation21], 0 }
   0xe   :  { %32 = vsyncpa [#allocation24], 0  ;;  %s3516_s23 = sld [smem:[#allocation36_spill]] }
  0x14   :  { %s52_s24 = sshll.u32 %s3516_s23, 4  ;;  %s53_s24 = int_to_ptr.hbm [resolvable:$true] %s52_s24 }
  0x15   :  { %33 = vsyncpa [#allocation4], 0  ;;  %s2925_s2 = smov [#allocation5]   ;;  %s3517_s27 = sld [smem:[#allocation38_spill]] }
  0x16   :  { %s54_s25 = sshll.u32 %s2925_s2, 4  ;;  %s2926_s4 = smov [#allocation8]   ;;  %s55_s25 = int_to_ptr.vmem [resolvable:$true] %s54_s25 }
  0x17   :  { %57 = dma.hbm_to_vmem [thread:$0]  %s53_s24, 128, %s55_s25, [#allocation6]  }
  0x18   :  { %s76_s29 = sshll.u32 %s2926_s4, 4  ;;  %s97_s21 = sshll.u32 %s3495_s6, 4  ;;  %s77_s29 = int_to_ptr.vmem [resolvable:$true] %s76_s29  ;;  %s98_s21 = int_to_ptr.hbm [resolvable:$true] %s97_s21 }
  0x19   :  { %s2927_s1 = smov [#allocation11]   ;;  %s125_s20 = sshll.u32 %s3498_s9, 4  ;;  %s126_s20 = int_to_ptr.hbm [resolvable:$true] %s125_s20 }
  0x1a   :  { %s99_s22 = sshll.u32 %s2927_s1, 4  ;;  %s2928_s3 = smov 16   ;;  %s100_s22 = int_to_ptr.vmem [resolvable:$true] %s99_s22 }
  0x1b   :  { %s74_s28 = sshll.u32 %s3517_s27, 4  ;;  %s2929_s26 = smov 1   ;;  %s75_s28 = int_to_ptr.hbm [resolvable:$true] %s74_s28 }
  0x1c   :  { %79 = dma.hbm_to_vmem [thread:$0]  %s75_s28, 16, %s77_s29, [#allocation9]  }
  0x1d   :  { %105 = dma.hbm_to_vmem [thread:$0]  %s98_s21, 32, %s100_s22, [#allocation12], %s2928_s3, %s2928_s3, %s2929_s26  }
  0x1e   :  { %s2930_s24 = smov [#allocation14]   ;;  %s153_s28 = sshll.u32 %s3501_s12, 4  ;;  %s154_s28 = int_to_ptr.hbm [resolvable:$true] %s153_s28 }
  0x1f   :  { %s127_s25 = sshll.u32 %s2930_s24, 4  ;;  %s181_s29 = sshll.u32 %s3504_s15, 4  ;;  %s128_s25 = int_to_ptr.vmem [resolvable:$true] %s127_s25  ;;  %s182_s29 = int_to_ptr.hbm [resolvable:$true] %s181_s29 }
  0x20   :  { %133 = dma.hbm_to_vmem [thread:$0]  %s126_s20, 32, %s128_s25, [#allocation15], %s2928_s3, %s2928_s3, %s2929_s26  }
  0x21   :  { %s2931_s30 = smov [#allocation17]   ;;  %s2932_s21 = smov [#allocation20]  }
  0x22   :  { %s155_s0 = sshll.u32 %s2931_s30, 4  ;;  %s183_s12 = sshll.u32 %s2932_s21, 4  ;;  %s156_s0 = int_to_ptr.vmem [resolvable:$true] %s155_s0  ;;  %s184_s12 = int_to_ptr.vmem [resolvable:$true] %s183_s12 }
  0x23   :  { %161 = dma.hbm_to_vmem [thread:$0]  %s154_s28, 32, %s156_s0, [#allocation18], %s2928_s3, %s2928_s3, %s2929_s26  }
  0x24   :  { %s3518_s23 = sld [smem:[#allocation35_spill]]  ;;  %s2933_s15 = smov [#allocation2]  }
  0x25   :  { %189 = dma.hbm_to_vmem [thread:$0]  %s182_s29, 32, %s184_s12, [#allocation21], %s2928_s3, %s2928_s3, %s2929_s26  }
  0x26   :  { %s40_s20 = sshll.u32 %s2933_s15, 4  ;;  %s3519_s6 = sld [smem:[#allocation37_spill]]  ;;  %s41_s20 = int_to_ptr.vmem [resolvable:$true] %s40_s20 }
  0x27   :  { %s2934_s28 = smov 128   ;;  %s2935_s9 = smov 8  }
  0x28   :  { %s2936_s4 = smov [#allocation7]   ;;  %s3520_s1 = sld [smem:[#allocation39_spill]] }
  0x29   :  { %s65_s30 = sshll.u32 %s2936_s4, 4  ;;  %s2937_s15 = smov [#allocation10]   ;;  %s66_s30 = int_to_ptr.vmem [resolvable:$true] %s65_s30 }
  0x2a   :  { %s38_s2 = sshll.u32 %s3518_s23, 4  ;;  %s112_s23 = sshll.u32 %s3497_s8, 4  ;;  %s39_s2 = int_to_ptr.hbm [resolvable:$true] %s38_s2  ;;  %s113_s23 = int_to_ptr.hbm [resolvable:$true] %s112_s23 }
  0x2b   :  { %46 = dma.hbm_to_vmem [thread:$0]  %s39_s2, 256, %s41_s20, [#allocation3], %s2934_s28, %s2934_s28, %s2935_s9  }
  0x2c   :  { %s63_s27 = sshll.u32 %s3519_s6, 4  ;;  %s87_s24 = sshll.u32 %s2937_s15, 4  ;;  %s64_s27 = int_to_ptr.hbm [resolvable:$true] %s63_s27  ;;  %s88_s24 = int_to_ptr.vmem [resolvable:$true] %s87_s24 }
  0x2d   :  { %68 = dma.hbm_to_vmem [thread:$0]  %s64_s27, 16, %s66_s30, [#allocation6]  }
  0x2e   :  { %s85_s22 = sshll.u32 %s3520_s1, 4  ;;  %s2938_s2 = smov [#allocation13]   ;;  %s86_s22 = int_to_ptr.hbm [resolvable:$true] %s85_s22 }
  0x2f   :  { %90 = dma.hbm_to_vmem [thread:$0]  %s86_s22, 16, %s88_s24, [#allocation9]  }
  0x30   :  { %s114_s20 = sshll.u32 %s2938_s2, 4  ;;  %s138_s28 = sshll.u32 %s3499_s10, 4  ;;  %s115_s20 = int_to_ptr.vmem [resolvable:$true] %s114_s20  ;;  %s139_s28 = int_to_ptr.hbm [resolvable:$true] %s138_s28 }
  0x31   :  { %120 = dma.hbm_to_vmem [thread:$0]  %s113_s23, 32, %s115_s20, [#allocation12], %s2928_s3, %s2928_s3, %s2929_s26  }
  0x32   :  { %s168_s8 = sshll.u32 %s3503_s14, 4  ;;  %s2939_s30 = smov [#allocation16]   ;;  %s169_s8 = int_to_ptr.hbm [resolvable:$true] %s168_s8 }
  0x33   :  { %s140_s0 = sshll.u32 %s2939_s30, 4  ;;  %s2940_s21 = smov [#allocation19]   ;;  %s141_s0 = int_to_ptr.vmem [resolvable:$true] %s140_s0 }
  0x34   :  { %146 = dma.hbm_to_vmem [thread:$0]  %s139_s28, 32, %s141_s0, [#allocation15], %s2928_s3, %s2928_s3, %s2929_s26  }
  0x35   :  { %s170_s10 = sshll.u32 %s2940_s21, 4  ;;  %s194_s29 = sshll.u32 %s3505_s16, 4  ;;  %s171_s10 = int_to_ptr.vmem [resolvable:$true] %s170_s10  ;;  %s195_s29 = int_to_ptr.hbm [resolvable:$true] %s194_s29 }
  0x36   :  { %176 = dma.hbm_to_vmem [thread:$0]  %s169_s8, 32, %s171_s10, [#allocation18], %s2928_s3, %s2928_s3, %s2929_s26  }
  0x37   :  { %s207_s23 = sshll.u32 %s3506_s17, 4  ;;  %s2941_s15 = smov [#allocation22]   ;;  %s208_s23 = int_to_ptr.hbm [resolvable:$true] %s207_s23 }
  0x38   :  { %s196_s24 = sshll.u32 %s2941_s15, 4  ;;  %s2942_s2 = smov [#allocation23]   ;;  %s197_s24 = int_to_ptr.vmem [resolvable:$true] %s196_s24 }
  0x39   :  { %202 = dma.hbm_to_vmem [thread:$0]  %s195_s29, 32, %s197_s24, [#allocation21], %s2928_s3, %s2928_s3, %s2929_s26  }
  0x3a   :  { %s209_s16 = sshll.u32 %s2942_s2, 4  ;;  %s2943_s20 = smov 64   ;;  %s210_s16 = int_to_ptr.vmem [resolvable:$true] %s209_s16 }
  0x3b   :  { %s2944_s25 = smov 4  }
  0x3c   :  { %215 = dma.hbm_to_vmem [thread:$0]  %s208_s23, 256, %s210_s16, [#allocation24], %s2943_s20, %s2943_s20, %s2944_s25  }
  0x3d   :  { %2907 = dma.done.wait [#allocation3], 256  }
  0x3e   :  { %2908 = vsyncadd [#allocation3], 4294967040 }
  0x3f   :  { %2909 = dma.done.wait [#allocation6], 144  }
  0x40   :  { %2910 = vsyncadd [#allocation6], 4294967152 }
  0x41   :  { %2911 = dma.done.wait [#allocation9], 32  }
  0x42   :  { %2912 = vsyncadd [#allocation9], 4294967264 }
  0x43   :  { %2913 = dma.done.wait [#allocation12], 64  }
  0x44   :  { %2914 = vsyncadd [#allocation12], 4294967232 }
  0x45   :  { %2915 = dma.done.wait [#allocation15], 64  }
  0x46   :  { %2916 = vsyncadd [#allocation15], 4294967232 }
  0x47   :  { %2917 = dma.done.wait [#allocation18], 64  }
  0x48   :  { %2918 = vsyncadd [#allocation18], 4294967232 }
  0x49   :  { %2919 = dma.done.wait [#allocation21], 64  }
  0x4a   :  { %2920 = vsyncadd [#allocation21], 4294967232 }
  0x4b   :  { %2921 = dma.done.wait [#allocation24], 256  }
  0x4c   :  { %2922 = vsyncadd [#allocation24], 4294967040  ;;  %v277_v0 = vld [vmem:[#allocation5] sm:$0xff]  ;;  %v278_v1 = vld [vmem:[#allocation2] sm:$0xff]  ;;  %vm290_vm0 = vcmask 261120   ;;  %v2945_v10 = vmov 32.0  }
  0x4d   :  { %v280_v2 = vadd.f32 %v278_v1, %v277_v0  ;;  %v2431_v3 = vld [vmem:[#allocation7] ss:$0 sm:$0xff]  ;;  %v279_v4 = vld [vmem:[#allocation2 + $0x8] sm:$0xff]  ;;  %2451 = vrcp.f32 %v2945_v10  ;;  %v2344_v29 = vld [vmem:[%s3494_s5] sm:$0xff]  ;;  %s2946_s27 = smov 112   ;;  %s2947_s4 = smov 96  }
  0x4e   :  { %v281_v6 = vadd.f32 %v279_v4, %v277_v0  ;;  %v2345_v27 = vld [vmem:[%s3494_s5 + $0x8] sm:$0xff]  ;;  %v2432_v48 = vld [vmem:[#allocation8] ss:$0 sm:$0xff]  ;;  %v2433_v53 = vld [vmem:[#allocation10] ss:$0 sm:$0xff]  ;;  %s2948_s8 = smov 80  }
  0x4f   :  { %v286_v5 = vadd.f32 %v2431_v3, %v280_v2  ;;  %382 = vmatpush.bf16.msra.mxu0 %v2345_v27  ;;  %v2434_v58 = vld [vmem:[#allocation11] ss:$0 sm:$0xff]  ;;  %s2949_s30 = smov 88   ;;  %s2950_s0 = smov 120   ;;  %vm393_vm8 = vcmask 64512   ;;  %vm663_vm9 = vcmask 130048  }
  0x50   :  { %v287_v8 = vadd.f32 %v2431_v3, %v281_v6  ;;  %s2951_s21 = smov 48   ;;  %s2952_s10 = smov 56   ;;  %vm665_vm10 = vcmask 195584  }
  0x51   :  { %v291_v7 = vsel %vm290_vm0, %v286_v5, 0.0  ;;  %s2953_s1 = smov 104   ;;  %s2954_s22 = smov 72  }
  0x52   :  { %292 = vadd.xlane.f32.xlu0 %v291_v7  ;;  %v294_v9 = vsel %vm290_vm0, %v287_v8, 0.0  ;;  %s2955_s29 = smov 40   ;;  %s2956_s14 = smov 24  }
  0x53   :  { %v2452_v11 = vpop.eup %2451  ;;  %383 = vmatpush.bf16.msra.mxu0 %v2344_v29  ;;  %s2957_s15 = smov [#allocation25]   ;;  %s3521_s25 = sld [smem:[#allocation40_spill]] }
  0x54   :  { %v298_v12 = vmul.f32 32.0, %v2452_v11  ;;  %vm302_vm1 = vweird.f32 %v2452_v11  ;;  %s2151_s24 = sshll.u32 %s2957_s15, 4  ;;  %s2152_s24 = int_to_ptr.vmem [resolvable:$true] %s2151_s24 }
  0x56   :  { %v299_v13 = vsub.f32 1.0, %v298_v12 }
  0x58   :  { %v300_v14 = vmul.f32 %v2452_v11, %v299_v13 }
  0x59   :  { %s2153_s17 = sshll.u32 %s3521_s25, 4  ;;  %s2154_s17 = int_to_ptr.hbm [resolvable:$true] %s2153_s17 }
  0x5a   :  { %295 = vadd.xlane.f32.xlu0 %v294_v9  ;;  %v301_v15 = vadd.f32 %v2452_v11, %v300_v14 }
  0x5c   :  { %v3134_v16 = vsel %vm302_vm1, %v2452_v11, %v301_v15 }
  0xc5   :  { %v293_v17 = vpop.xlane.xlu0 %292 }
  0xc6   :  { %v304_v18 = vmul.f32 %v3134_v16, %v293_v17 }
  0xc8   :  { %v306_v19 = vsub.f32 %v286_v5, %v304_v18 }
  0xca   :  { %v308_v20 = vmul.f32 %v306_v19, %v306_v19 }
  0xcc   :  { %v310_v21 = vsel %vm290_vm0, %v308_v20, 0.0 }
  0xcd   :  { %311 = vadd.xlane.f32.xlu1 %v310_v21  ;;  %v296_v22 = vpop.xlane.xlu0 %295 }
  0xce   :  { %v305_v23 = vmul.f32 %v3134_v16, %v296_v22 }
  0xd0   :  { %v307_v24 = vsub.f32 %v287_v8, %v305_v23 }
  0xd2   :  { %v309_v25 = vmul.f32 %v307_v24, %v307_v24 }
  0xd4   :  { %v313_v26 = vsel %vm290_vm0, %v309_v25, 0.0 }
  0xd5   :  { %314 = vadd.xlane.f32.xlu1 %v313_v26 }
 0x140   :  { %v312_v28 = vpop.xlane.xlu1 %311 }
 0x141   :  { %v316_v30 = vmul.f32 %v312_v28, %v3134_v16 }
 0x143   :  { %v318_v31 = vadd.f32 1e-12, %v316_v30 }
 0x145   :  { %2453 = vrsqrt.f32 %v318_v31  ;;  %vm326_vm3 = vweird.f32 %v318_v31 }
 0x148   :  { %v315_v32 = vpop.xlane.xlu1 %314 }
 0x149   :  { %v317_v33 = vmul.f32 %v315_v32, %v3134_v16 }
 0x14b   :  { %v2454_v34 = vpop.eup %2453  ;;  %v319_v35 = vadd.f32 1e-12, %v317_v33 }
 0x14c   :  { %v321_v36 = vmul.f32 %v2454_v34, %v318_v31  ;;  %vm327_vm2 = vweird.f32 %v2454_v34 }
 0x14d   :  { %2455 = vrsqrt.f32 %v319_v35  ;;  %vm328_vm4 = vmor %vm326_vm3, %vm327_vm2  ;;  %vm336_vm6 = vweird.f32 %v319_v35  ;;  %vm1130_vm2 = vcmask 523264  }
 0x14e   :  { %v322_v37 = vmul.f32 %v2454_v34, %v321_v36 }
 0x150   :  { %v323_v38 = vmul.f32 0.5, %v322_v37 }
 0x152   :  { %v324_v39 = vsub.f32 1.5, %v323_v38 }
 0x153   :  { %v2456_v40 = vpop.eup %2455 }
 0x154   :  { %v325_v41 = vmul.f32 %v2454_v34, %v324_v39  ;;  %v331_v42 = vmul.f32 %v2456_v40, %v319_v35  ;;  %vm337_vm5 = vweird.f32 %v2456_v40 }
 0x155   :  { %vm338_vm7 = vmor %vm336_vm6, %vm337_vm5 }
 0x156   :  { %v332_v43 = vmul.f32 %v2456_v40, %v331_v42  ;;  %v329_v44 = vsel %vm328_vm4, %v2454_v34, %v325_v41 }
 0x157   :  { %v340_v47 = vmul.f32 %v329_v44, %v306_v19 }
 0x158   :  { %v333_v45 = vmul.f32 0.5, %v332_v43 }
 0x159   :  { %v345_v52 = vmul.f32 %v2432_v48, %v340_v47 }
 0x15a   :  { %v334_v46 = vsub.f32 1.5, %v333_v45 }
 0x15b   :  { %v3148_v55 = vadd.f32 %v2433_v53, %v345_v52 }
 0x15c   :  { %v335_v49 = vmul.f32 %v2456_v40, %v334_v46 }
 0x15e   :  { %v339_v50 = vsel %vm338_vm7, %v2456_v40, %v335_v49 }
 0x15f   :  { %v341_v51 = vmul.f32 %v339_v50, %v307_v24 }
 0x161   :  { %v346_v54 = vmul.f32 %v2432_v48, %v341_v51 }
 0x163   :  { %v3150_v56 = vadd.f32 %v2433_v53, %v346_v54 }
 0x165   :  { %v352_v57 = vpack.c.bf16 %v3150_v56, %v3148_v55 }
 0x167   :  { %2178 = vmatmul.msk.bf16.vlgmr.msra.gmra.mxu0 %vm290_vm0, %v352_v57 }
 0x1e4   :  { %v385_v59 = vpop.f32.mrf.mxu0 }
 0x1e5   :  { %v3155_v60 = vadd.f32 %v2434_v58, %v385_v59 }
 0x1e7   :  { %520 = vrot.lane.b32.xlu0 %v3155_v60, %s2946_s27  ;;  %391 = vrot.lane.b32.xlu2 %v3155_v60, %s2947_s4 }
 0x1ec   :  { %v387_v61 = vpop.f32.mrf.mxu0 }
 0x1ed   :  { %v3167_v62 = vadd.f32 %v2434_v58, %v387_v61 }
 0x1ef   :  { %522 = vrot.lane.b32.xlu2 %v3155_v60, %s2948_s8 }
 0x1f7   :  { %457 = vrot.lane.b32.xlu2 %v3155_v60, %s2949_s30 }
 0x1ff   :  { %455 = vrot.lane.b32.xlu2 %v3155_v60, %s2950_s0 }
 0x207   :  { %668 = vrot.lane.b32.xlu2 %v3167_v62, %s2947_s4 }
 0x241   :  { %v392_v63 = vpop.permute.xlu2 %391 }
 0x242   :  { %2179 = vmatpush.xpose.msk.msra.mxu1 %vm393_vm8, %v392_v63 }
 0x245   :  { %2180 = vmatmul.msk.f32.vlgmr.msra.gmra.mxu1 %vm393_vm8, %v3155_v60 }
 0x249   :  { %v523_v0 = vpop.permute.xlu2 %522 }
 0x24a   :  { %2185 = vmatpush.xpose.msk.msrb.mxu1 %vm393_vm8, %v523_v0 }
 0x251   :  { %v458_v1 = vpop.permute.xlu2 %457 }
 0x252   :  { %2182 = vmatpush.xpose.msk.msra.mxu3 %vm393_vm8, %v458_v1 }
 0x259   :  { %v521_v2 = vpop.permute.xlu0 %520  ;;  %v456_v3 = vpop.permute.xlu2 %455 }
 0x25a   :  { %2183 = vmatmul.msk.f32.vlgmr.msra.gmra.mxu3 %vm393_vm8, %v456_v3  ;;  %2186 = vmatmul.msk.f32.vlgmr.msrb.gmra.mxu1 %vm393_vm8, %v521_v2 }
 0x261   :  { %v669_v15 = vpop.permute.xlu2 %668 }
 0x2c2   :  { %v415_v4 = vpop.f32.mrf.mxu1 }
 0x2c3   :  { %v418_v5 = vsel %vm393_vm8, %v415_v4, -inf }
 0x2c4   :  { %419 = vmax.xlane.f32.xlu0 %v418_v5 }
 0x2d7   :  { %v545_v6 = vpop.f32.mrf.mxu1 }
 0x2d8   :  { %v548_v7 = vsel %vm393_vm8, %v545_v6, -inf }
 0x2d9   :  { %549 = vmax.xlane.f32.xlu1 %v548_v7 }
 0x2dd   :  { %v480_v8 = vpop.f32.mrf.mxu3 }
 0x2de   :  { %v483_v9 = vsel %vm393_vm8, %v480_v8, -inf }
 0x2df   :  { %484 = vmax.xlane.f32.xlu2 %v483_v9 }
 0x337   :  { %v420_v10 = vpop.xlane.xlu0 %419 }
 0x338   :  { %v421_v11 = vsub.f32 %v415_v4, %v420_v10 }
 0x33a   :  { %v422_v12 = vmul.f32 1.442695, %v421_v11 }
 0x33c   :  { %2457 = vpow2.f32 %v422_v12 }
 0x342   :  { %v2458_v13 = vpop.eup %2457 }
 0x343   :  { %v424_v14 = vsel %vm393_vm8, %v2458_v13, 0.0 }
 0x344   :  { %425 = vadd.xlane.f32.xlu0 %v424_v14 }
 0x34c   :  { %v550_v17 = vpop.xlane.xlu1 %549 }
 0x34d   :  { %v551_v18 = vsub.f32 %v545_v6, %v550_v17 }
 0x34f   :  { %v552_v19 = vmul.f32 1.442695, %v551_v18 }
 0x351   :  { %2459 = vpow2.f32 %v552_v19 }
 0x352   :  { %v485_v20 = vpop.xlane.xlu2 %484 }
 0x353   :  { %v486_v21 = vsub.f32 %v480_v8, %v485_v20 }
 0x355   :  { %v487_v22 = vmul.f32 1.442695, %v486_v21 }
 0x357   :  { %v2460_v23 = vpop.eup %2459  ;;  %2461 = vpow2.f32 %v487_v22 }
 0x358   :  { %429 = vrot.lane.b32.xlu0 %v3155_v60, %s2943_s20  ;;  %v554_v24 = vsel %vm393_vm8, %v2460_v23, 0.0 }
 0x359   :  { %555 = vadd.xlane.f32.xlu1 %v554_v24 }
 0x35d   :  { %v2462_v25 = vpop.eup %2461 }
 0x35e   :  { %v489_v26 = vsel %vm393_vm8, %v2462_v25, 0.0 }
 0x35f   :  { %490 = vadd.xlane.f32.xlu2 %v489_v26 }
 0x372   :  { %559 = vrot.lane.b32.xlu1 %v3155_v60, %s2951_s21 }
 0x377   :  { %494 = vrot.lane.b32.xlu2 %v3155_v60, %s2952_s10 }
 0x37f   :  { %585 = vrot.lane.b32.xlu2 %v3155_v60, %s2953_s1 }
 0x387   :  { %705 = vrot.lane.b32.xlu2 %v3167_v62, %s2943_s20 }
 0x38f   :  { %731 = vrot.lane.b32.xlu2 %v3167_v62, %s2950_s0 }
 0x397   :  { %863 = vrot.lane.b32.xlu2 %v3167_v62, %s2954_s22 }
 0x39f   :  { %861 = vrot.lane.b32.xlu2 %v3167_v62, %s2953_s1 }
 0x3b7   :  { %v426_v27 = vpop.xlane.xlu0 %425 }
 0x3b8   :  { %2463 = vrcp.f32 %v426_v27 }
 0x3be   :  { %v2464_v28 = vpop.eup %2463 }
 0x3bf   :  { %v428_v30 = vmul.f32 %v2464_v28, %v2458_v13 }
 0x3ca   :  { %v430_v29 = vpop.permute.xlu0 %429 }
 0x3cb   :  { %450 = vmatpush.msra.mxu2 %v430_v29 }
 0x3cc   :  { %2181 = vmatmul.msk.f32.vlgmr.msra.gmra.mxu2 %vm393_vm8, %v428_v30  ;;  %v556_v32 = vpop.xlane.xlu1 %555 }
 0x3d2   :  { %v491_v31 = vpop.xlane.xlu2 %490 }
 0x3d3   :  { %2465 = vrcp.f32 %v491_v31 }
 0x3d4   :  { %2467 = vrcp.f32 %v556_v32 }
 0x3d9   :  { %v2466_v33 = vpop.eup %2465 }
 0x3da   :  { %v495_v34 = vpop.permute.xlu2 %494  ;;  %v493_v35 = vmul.f32 %v2466_v33, %v2462_v25  ;;  %v2468_v36 = vpop.eup %2467 }
 0x3db   :  { %515 = vmatpush.msrb.mxu2 %v495_v34  ;;  %v558_v38 = vmul.f32 %v2468_v36, %v2460_v23 }
 0x3dc   :  { %2184 = vmatmul.msk.f32.vlgmr.msrb.gmra.mxu2 %vm393_vm8, %v493_v35 }
 0x3e2   :  { %v586_v47 = vpop.permute.xlu2 %585 }
 0x3e4   :  { %v560_v37 = vpop.permute.xlu1 %559 }
 0x3e5   :  { %580 = vmatpush.msrb.mxu3 %v560_v37 }
 0x3e6   :  { %2187 = vmatmul.msk.f32.vlgmr.msrb.gmra.mxu3 %vm393_vm8, %v558_v38 }
 0x3e7   :  { %2191 = vmatpush.xpose.msk.msra.mxu3 %vm393_vm8, %v669_v15 }
 0x3ea   :  { %v706_v49 = vpop.permute.xlu2 %705 }
 0x3ee   :  { %2192 = vmatmul.msk.f32.vlgmr.msra.gmra.mxu3 %vm393_vm8, %v3167_v62 }
 0x3f2   :  { %v732_v53 = vpop.permute.xlu2 %731 }
 0x3fa   :  { %v864_v59 = vpop.permute.xlu2 %863 }
 0x402   :  { %v862_v0 = vpop.permute.xlu2 %861 }
 0x44f   :  { %v3225_v61 = vpop.f32.mrf.mxu2 }
 0x45f   :  { %v3228_v63 = vpop.f32.mrf.mxu2 }
 0x469   :  { %v3206_v39 = vpop.f32.mrf.mxu3 }
 0x471   :  { %v691_v40 = vpop.f32.mrf.mxu3 }
 0x472   :  { %v694_v41 = vsel %vm393_vm8, %v691_v40, -inf }
 0x473   :  { %695 = vmax.xlane.f32.xlu1 %v694_v41 }
 0x48c   :  { %587 = vrot.lane.b32.xlu1 %v3155_v60, %s2954_s22 }
 0x494   :  { %733 = vrot.lane.b32.xlu1 %v3167_v62, %s2949_s30 }
 0x49c   :  { %798 = vrot.lane.b32.xlu1 %v3167_v62, %s2948_s8 }
 0x4a4   :  { %796 = vrot.lane.b32.xlu1 %v3167_v62, %s2946_s27 }
 0x4e6   :  { %v696_v42 = vpop.xlane.xlu1 %695 }
 0x4e7   :  { %v697_v43 = vsub.f32 %v691_v40, %v696_v42 }
 0x4e9   :  { %v698_v44 = vmul.f32 1.442695, %v697_v43 }
 0x4eb   :  { %2469 = vpow2.f32 %v698_v44 }
 0x4f1   :  { %v2470_v45 = vpop.eup %2469 }
 0x4f2   :  { %v700_v46 = vsel %vm393_vm8, %v2470_v45, 0.0 }
 0x4f3   :  { %701 = vadd.xlane.f32.xlu0 %v700_v46 }
 0x4fe   :  { %v588_v48 = vpop.permute.xlu1 %587 }
 0x4ff   :  { %2188 = vmatpush.xpose.msk.msra.mxu2 %vm393_vm8, %v588_v48 }
 0x502   :  { %2189 = vmatmul.msk.f32.vlgmr.msra.gmra.mxu2 %vm393_vm8, %v586_v47 }
 0x503   :  { %726 = vmatpush.msrb.mxu2 %v706_v49 }
 0x506   :  { %v734_v50 = vpop.permute.xlu1 %733 }
 0x507   :  { %2194 = vmatpush.xpose.msk.msra.mxu2 %vm393_vm8, %v734_v50 }
 0x50e   :  { %v799_v51 = vpop.permute.xlu1 %798 }
 0x50f   :  { %2197 = vmatpush.xpose.msk.msrb.mxu3 %vm393_vm8, %v799_v51 }
 0x516   :  { %v797_v52 = vpop.permute.xlu1 %796 }
 0x517   :  { %2198 = vmatmul.msk.f32.vlgmr.msrb.gmra.mxu3 %vm393_vm8, %v797_v52 }
 0x566   :  { %v702_v54 = vpop.xlane.xlu0 %701 }
 0x567   :  { %2471 = vrcp.f32 %v702_v54  ;;  %v2346_v54 = vld [vmem:[%s3496_s7] sm:$0xff] }
 0x56d   :  { %v2472_v57 = vpop.eup %2471 }
 0x56e   :  { %v704_v58 = vmul.f32 %v2472_v57, %v2470_v45 }
 0x570   :  { %2193 = vmatmul.msk.f32.vlgmr.msrb.gmra.mxu2 %vm393_vm8, %v704_v58 }
 0x571   :  { %2200 = vmatpush.xpose.msk.msrb.mxu2 %vm393_vm8, %v864_v59 }
 0x578   :  { %2195 = vmatmul.msk.f32.vlgmr.msra.gmra.mxu2 %vm393_vm8, %v732_v53  ;;  %v2347_v53 = vld [vmem:[%s3496_s7 + $0x8] sm:$0xff] }
 0x579   :  { %971 = vmatpush.bf16.msra.mxu3 %v2347_v53 }
 0x57d   :  { %972 = vmatpush.bf16.msra.mxu3 %v2346_v54 }
 0x580   :  { %2201 = vmatmul.msk.f32.vlgmr.msrb.gmra.mxu2 %vm393_vm8, %v862_v0 }
 0x585   :  { %v610_v1 = vpop.f32.mrf.mxu2 }
 0x586   :  { %v613_v2 = vsel %vm393_vm8, %v610_v1, -inf }
 0x587   :  { %614 = vmax.xlane.f32.xlu0 %v613_v2 }
 0x59a   :  { %v821_v3 = vpop.f32.mrf.mxu3 }
 0x59b   :  { %v824_v4 = vsel %vm393_vm8, %v821_v3, -inf }
 0x59c   :  { %825 = vmax.xlane.f32.xlu2 %v824_v4 }
 0x5f3   :  { %v3233_v5 = vpop.f32.mrf.mxu2 }
 0x5fa   :  { %v615_v6 = vpop.xlane.xlu0 %614 }
 0x5fb   :  { %v616_v7 = vsub.f32 %v610_v1, %v615_v6  ;;  %v756_v8 = vpop.f32.mrf.mxu2 }
 0x5fc   :  { %v759_v9 = vsel %vm393_vm8, %v756_v8, -inf }
 0x5fd   :  { %v617_v10 = vmul.f32 1.442695, %v616_v7  ;;  %760 = vmax.xlane.f32.xlu1 %v759_v9 }
 0x5ff   :  { %2473 = vpow2.f32 %v617_v10 }
 0x603   :  { %v886_v13 = vpop.f32.mrf.mxu2 }
 0x604   :  { %v889_v14 = vsel %vm393_vm8, %v886_v13, -inf }
 0x605   :  { %v2474_v11 = vpop.eup %2473 }
 0x606   :  { %v619_v12 = vsel %vm393_vm8, %v2474_v11, 0.0 }
 0x607   :  { %620 = vadd.xlane.f32.xlu0 %v619_v12  ;;  %v2435_v12 = vld [vmem:[#allocation13] ss:$0 sm:$0xff] }
 0x60f   :  { %890 = vmax.xlane.f32.xlu0 %v889_v14  ;;  %v826_v15 = vpop.xlane.xlu2 %825 }
 0x610   :  { %v827_v17 = vsub.f32 %v821_v3, %v826_v15 }
 0x612   :  { %v828_v18 = vmul.f32 1.442695, %v827_v17 }
 0x614   :  { %2475 = vpow2.f32 %v828_v18 }
 0x61a   :  { %v2476_v19 = vpop.eup %2475 }
 0x61b   :  { %v830_v20 = vsel %vm393_vm8, %v2476_v19, 0.0 }
 0x61c   :  { %831 = vadd.xlane.f32.xlu1 %v830_v20 }
 0x623   :  { %624 = vrot.lane.b32.xlu0 %v3155_v60, %s2955_s29 }
 0x635   :  { %770 = vrot.lane.b32.xlu1 %v3167_v62, %s2952_s10 }
 0x670   :  { %v761_v21 = vpop.xlane.xlu1 %760 }
 0x671   :  { %v762_v22 = vsub.f32 %v756_v8, %v761_v21 }
 0x673   :  { %v763_v23 = vmul.f32 1.442695, %v762_v22 }
 0x675   :  { %2477 = vpow2.f32 %v763_v23 }
 0x67a   :  { %v621_v24 = vpop.xlane.xlu0 %620 }
 0x67b   :  { %v2478_v25 = vpop.eup %2477 }
 0x67c   :  { %v765_v26 = vsel %vm393_vm8, %v2478_v25, 0.0 }
 0x67d   :  { %766 = vadd.xlane.f32.xlu0 %v765_v26 }
 0x682   :  { %v891_v27 = vpop.xlane.xlu0 %890 }
 0x683   :  { %v892_v28 = vsub.f32 %v886_v13, %v891_v27 }
 0x685   :  { %v893_v29 = vmul.f32 1.442695, %v892_v28 }
 0x687   :  { %2479 = vpow2.f32 %v893_v29 }
 0x688   :  { %2481 = vrcp.f32 %v621_v24 }
 0x68d   :  { %v2480_v30 = vpop.eup %2479 }
 0x68e   :  { %v895_v60 = vsel %vm393_vm8, %v2480_v30, 0.0  ;;  %v2482_v31 = vpop.eup %2481 }
 0x68f   :  { %896 = vadd.xlane.f32.xlu2 %v895_v60  ;;  %v623_v32 = vmul.f32 %v2482_v31, %v2474_v11  ;;  %v832_v34 = vpop.xlane.xlu1 %831  ;;  %v2348_v31 = vld [vmem:[%s3500_s11] sm:$0xff] }
 0x691   :  { %835 = vrot.lane.b32.xlu0 %v3167_v62, %s2951_s21 }
 0x695   :  { %v625_v33 = vpop.permute.xlu0 %624 }
 0x696   :  { %645 = vmatpush.msra.mxu1 %v625_v33 }
 0x697   :  { %2190 = vmatmul.msk.f32.vlgmr.msra.gmra.mxu1 %vm393_vm8, %v623_v32 }
 0x6a7   :  { %900 = vrot.lane.b32.xlu2 %v3167_v62, %s2955_s29  ;;  %v771_v35 = vpop.permute.xlu1 %770 }
 0x6a8   :  { %791 = vmatpush.msrb.mxu1 %v771_v35 }
 0x6f0   :  { %v767_v36 = vpop.xlane.xlu0 %766 }
 0x6f1   :  { %2483 = vrcp.f32 %v767_v36 }
 0x6f2   :  { %2485 = vrcp.f32 %v832_v34 }
 0x6f7   :  { %v2484_v37 = vpop.eup %2483 }
 0x6f8   :  { %v769_v38 = vmul.f32 %v2484_v37, %v2478_v25  ;;  %v2486_v40 = vpop.eup %2485 }
 0x6f9   :  { %v834_v43 = vmul.f32 %v2486_v40, %v2476_v19 }
 0x6fa   :  { %2196 = vmatmul.msk.f32.vlgmr.msrb.gmra.mxu1 %vm393_vm8, %v769_v38 }
 0x702   :  { %v897_v41 = vpop.xlane.xlu2 %896 }
 0x703   :  { %2487 = vrcp.f32 %v897_v41  ;;  %v836_v42 = vpop.permute.xlu0 %835 }
 0x704   :  { %856 = vmatpush.msrb.mxu0 %v836_v42 }
 0x705   :  { %2199 = vmatmul.msk.f32.vlgmr.msrb.gmra.mxu0 %vm393_vm8, %v834_v43 }
 0x709   :  { %v2488_v44 = vpop.eup %2487 }
 0x70a   :  { %v899_v45 = vmul.f32 %v2488_v44, %v2480_v30  ;;  %v901_v62 = vpop.permute.xlu2 %900 }
 0x70b   :  { %921 = vmatpush.msra.mxu1 %v901_v62 }
 0x70c   :  { %2202 = vmatmul.msk.f32.vlgmr.msra.gmra.mxu1 %vm393_vm8, %v899_v45 }
 0x714   :  { %v647_v46 = vpop.f32.mrf.mxu1 }
 0x777   :  { %v793_v47 = vpop.f32.mrf.mxu1 }
 0x778   :  { %v2401_v48 = vpack.i.bf16 %v793_v47, %v3228_v63  ;;  %v2436_v47 = vld [vmem:[#allocation14] ss:$0 sm:$0xff] }
 0x77a   :  { %2402 = vrot.lane.b32.xlu0 %v2401_v48, %s2935_s9 }
 0x782   :  { %v858_v49 = vpop.f32.mrf.mxu0 }
 0x783   :  { %v2406_v50 = vpack.i.bf16 %v858_v49, %v3206_v39 }
 0x785   :  { %2407 = vrot.lane.b32.xlu0 %v2406_v50, %s2928_s3 }
 0x789   :  { %v923_v51 = vpop.f32.mrf.mxu1 }
 0x78a   :  { %v2411_v52 = vpack.i.bf16 %v923_v51, %v647_v46  ;;  %v2437_v51 = vld [vmem:[#allocation16] ss:$0 sm:$0xff] }
 0x78c   :  { %2412 = vrot.lane.b32.xlu1 %v2411_v52, %s2956_s14 }
 0x7ec   :  { %v2403_v57 = vpop.permute.xlu0 %2402 }
 0x7ed   :  { %v2405_v39 = vunpack.i.h.bf16 %v2403_v57  ;;  %v2404_v59 = vunpack.i.l.bf16 %v2403_v57 }
 0x7ef   :  { %v938_v2 = vsel %vm393_vm8, %v3233_v5, %v2405_v39  ;;  %v662_v3 = vsel %vm393_vm8, %v3225_v61, %v2404_v59  ;;  %v2353_v59 = vld [vmem:[%s3502_s13 + $0x18] sm:$0xff] }
 0x7f0   :  { %1138 = vmatpush.bf16.msra.mxu2 %v2353_v59 }
 0x7f7   :  { %v2408_v58 = vpop.permute.xlu0 %2407 }
 0x7f8   :  { %v2410_v63 = vunpack.i.h.bf16 %v2408_v58  ;;  %v2409_v0 = vunpack.i.l.bf16 %v2408_v58 }
 0x7fa   :  { %v664_v7 = vsel %vm663_vm9, %v662_v3, %v2409_v0  ;;  %v939_v8 = vsel %vm663_vm9, %v938_v2, %v2410_v63  ;;  %v2352_v63 = vld [vmem:[%s3502_s13 + $0x10] sm:$0xff]  ;;  %v2351_v0 = vld [vmem:[%s3502_s13 + $0x8] sm:$0xff]  ;;  %v2438_v2 = vld [vmem:[#allocation17] ss:$0 sm:$0xff] }
 0x7fb   :  { %1139 = vmatpush.bf16.msra.mxu2 %v2352_v63 }
 0x7fe   :  { %v2413_v1 = vpop.permute.xlu1 %2412 }
 0x7ff   :  { %v2415_v4 = vunpack.i.h.bf16 %v2413_v1  ;;  %v2414_v6 = vunpack.i.l.bf16 %v2413_v1  ;;  %1140 = vmatpush.bf16.msra.mxu2 %v2351_v0  ;;  %v2350_v1 = vld [vmem:[%s3502_s13] sm:$0xff] }
 0x801   :  { %v940_v9 = vsel %vm665_vm10, %v939_v8, %v2415_v4  ;;  %v666_v10 = vsel %vm665_vm10, %v664_v7, %v2414_v6 }
 0x802   :  { %v941_v11 = vpack.c.bf16 %v940_v9, %v666_v10 }
 0x803   :  { %1141 = vmatpush.bf16.msra.mxu2 %v2350_v1 }
 0x804   :  { %2211 = vmatmul.msk.bf16.vlgmr.msra.gmra.mxu3 %vm290_vm0, %v941_v11 }
 0x887   :  { %v974_v13 = vpop.f32.mrf.mxu3 }
 0x888   :  { %v975_v14 = vadd.f32 %v2435_v12, %v974_v13 }
 0x88a   :  { %v979_v5 = vadd.f32 %v975_v14, %v3148_v55 }
 0x88c   :  { %v983_v61 = vsel %vm290_vm0, %v979_v5, 0.0 }
 0x88d   :  { %984 = vadd.xlane.f32.xlu0 %v983_v61 }
 0x88f   :  { %v976_v15 = vpop.f32.mrf.mxu3 }
 0x890   :  { %v977_v17 = vadd.f32 %v2435_v12, %v976_v15 }
 0x892   :  { %v980_v18 = vadd.f32 %v977_v17, %v3150_v56  ;;  %v2349_v56 = vld [vmem:[%s3500_s11 + $0x8] sm:$0xff] }
 0x893   :  { %1067 = vmatpush.bf16.msra.mxu0 %v2349_v56 }
 0x894   :  { %v986_v19 = vsel %vm290_vm0, %v980_v18, 0.0 }
 0x895   :  { %987 = vadd.xlane.f32.xlu2 %v986_v19 }
 0x897   :  { %1068 = vmatpush.bf16.msra.mxu0 %v2348_v31 }
 0x900   :  { %v985_v20 = vpop.xlane.xlu0 %984 }
 0x901   :  { %v989_v21 = vmul.f32 %v985_v20, %v3134_v16 }
 0x903   :  { %v991_v22 = vsub.f32 %v979_v5, %v989_v21 }
 0x905   :  { %v993_v23 = vmul.f32 %v991_v22, %v991_v22 }
 0x907   :  { %v995_v24 = vsel %vm290_vm0, %v993_v23, 0.0 }
 0x908   :  { %v988_v25 = vpop.xlane.xlu2 %987  ;;  %996 = vadd.xlane.f32.xlu1 %v995_v24 }
 0x909   :  { %v990_v55 = vmul.f32 %v988_v25, %v3134_v16 }
 0x90b   :  { %v992_v26 = vsub.f32 %v980_v18, %v990_v55  ;;  %v2439_v55 = vld [vmem:[#allocation19] ss:$0 sm:$0xff] }
 0x90d   :  { %v994_v27 = vmul.f32 %v992_v26, %v992_v26 }
 0x90f   :  { %v998_v28 = vsel %vm290_vm0, %v994_v27, 0.0 }
 0x910   :  { %999 = vadd.xlane.f32.xlu0 %v998_v28 }
 0x97b   :  { %v997_v29 = vpop.xlane.xlu1 %996 }
 0x97c   :  { %v1001_v30 = vmul.f32 %v997_v29, %v3134_v16 }
 0x97e   :  { %v1003_v60 = vadd.f32 1e-12, %v1001_v30 }
 0x980   :  { %2489 = vrsqrt.f32 %v1003_v60  ;;  %vm1011_vm12 = vweird.f32 %v1003_v60 }
 0x983   :  { %v1000_v32 = vpop.xlane.xlu0 %999 }
 0x984   :  { %v1002_v33 = vmul.f32 %v1000_v32, %v3134_v16 }
 0x986   :  { %v2490_v34 = vpop.eup %2489  ;;  %v1004_v35 = vadd.f32 1e-12, %v1002_v33 }
 0x987   :  { %v1006_v36 = vmul.f32 %v2490_v34, %v1003_v60  ;;  %vm1012_vm11 = vweird.f32 %v2490_v34 }
 0x988   :  { %2491 = vrsqrt.f32 %v1004_v35  ;;  %vm1013_vm13 = vmor %vm1011_vm12, %vm1012_vm11  ;;  %vm1021_vm15 = vweird.f32 %v1004_v35 }
 0x989   :  { %v1007_v37 = vmul.f32 %v2490_v34, %v1006_v36 }
 0x98b   :  { %v1008_v38 = vmul.f32 0.5, %v1007_v37 }
 0x98d   :  { %v1009_v40 = vsub.f32 1.5, %v1008_v38 }
 0x98e   :  { %v2492_v41 = vpop.eup %2491 }
 0x98f   :  { %v1010_v42 = vmul.f32 %v2490_v34, %v1009_v40  ;;  %v1016_v43 = vmul.f32 %v2492_v41, %v1004_v35  ;;  %vm1022_vm14 = vweird.f32 %v2492_v41 }
 0x990   :  { %vm1023_vm1 = vmor %vm1021_vm15, %vm1022_vm14 }
 0x991   :  { %v1017_v44 = vmul.f32 %v2492_v41, %v1016_v43  ;;  %v1014_v45 = vsel %vm1013_vm13, %v2490_v34, %v1010_v42  ;;  %v2355_v43 = vld [vmem:[%s3494_s5 + $0x18] sm:$0xff] }
 0x992   :  { %v1025_v48 = vmul.f32 %v1014_v45, %v991_v22  ;;  %1238 = vmatpush.bf16.msrb.mxu1 %v2355_v43 }
 0x993   :  { %v1018_v62 = vmul.f32 0.5, %v1017_v44 }
 0x994   :  { %v1030_v52 = vmul.f32 %v2436_v47, %v1025_v48 }
 0x995   :  { %v1019_v46 = vsub.f32 1.5, %v1018_v62 }
 0x996   :  { %v1035_v57 = vadd.f32 %v2437_v51, %v1030_v52 }
 0x997   :  { %v1020_v49 = vmul.f32 %v2492_v41, %v1019_v46  ;;  %v2354_v46 = vld [vmem:[%s3494_s5 + $0x10] sm:$0xff] }
 0x998   :  { %1239 = vmatpush.bf16.msrb.mxu1 %v2354_v46 }
 0x999   :  { %v1024_v50 = vsel %vm1023_vm1, %v2492_v41, %v1020_v49 }
 0x99a   :  { %v1026_v53 = vmul.f32 %v1024_v50, %v992_v26 }
 0x99c   :  { %v1031_v54 = vmul.f32 %v2436_v47, %v1026_v53 }
 0x99e   :  { %v1036_v58 = vadd.f32 %v2437_v51, %v1031_v54 }
 0x9a0   :  { %v1037_v39 = vpack.c.bf16 %v1036_v58, %v1035_v57 }
 0x9a2   :  { %2220 = vmatmul.msk.bf16.vlgmr.msra.gmra.mxu0 %vm290_vm0, %v1037_v39 }
 0xa1f   :  { %v1070_v3 = vpop.f32.mrf.mxu0 }
 0xa20   :  { %v1071_v4 = vadd.f32 %v2438_v2, %v1070_v3 }
 0xa22   :  { %v1077_v6 = vmul.f32 0.044715, %v1071_v4  ;;  %v1075_v20 = vmul.f32 0.5, %v1071_v4 }
 0xa24   :  { %v1079_v7 = vmul.f32 %v1077_v6, %v1071_v4 }
 0xa26   :  { %v1081_v8 = vmul.f32 %v1079_v7, %v1071_v4  ;;  %v2441_v7 = vld [vmem:[#allocation22] ss:$0 sm:$0xff] }
 0xa27   :  { %v1072_v9 = vpop.f32.mrf.mxu0 }
 0xa28   :  { %v1083_v10 = vadd.f32 %v1081_v8, %v1071_v4  ;;  %v1073_v11 = vadd.f32 %v2438_v2, %v1072_v9  ;;  %v2440_v2 = vld [vmem:[#allocation20] ss:$0 sm:$0xff] }
 0xa2a   :  { %v1078_v12 = vmul.f32 0.044715, %v1073_v11  ;;  %v1085_v13 = vmul.f32 0.7978846, %v1083_v10  ;;  %v1076_v21 = vmul.f32 0.5, %v1073_v11 }
 0xa2c   :  { %v1080_v14 = vmul.f32 %v1078_v12, %v1073_v11  ;;  %2493 = vtanh.f32 %v1085_v13 }
 0xa2e   :  { %v1082_v5 = vmul.f32 %v1080_v14, %v1073_v11  ;;  %v2442_v14 = vld [vmem:[#allocation11 + $0x1] ss:$0 sm:$0xff] }
 0xa30   :  { %v1084_v61 = vadd.f32 %v1082_v5, %v1073_v11 }
 0xa32   :  { %v1086_v15 = vmul.f32 0.7978846, %v1084_v61  ;;  %v2494_v17 = vpop.eup %2493 }
 0xa33   :  { %v1089_v18 = vadd.f32 1.0, %v2494_v17 }
 0xa34   :  { %2495 = vtanh.f32 %v1086_v15 }
 0xa35   :  { %v1091_v23 = vmul.f32 %v1089_v18, %v1075_v20 }
 0xa3a   :  { %v2496_v19 = vpop.eup %2495 }
 0xa3b   :  { %v1090_v22 = vadd.f32 1.0, %v2496_v19 }
 0xa3d   :  { %v1092_v24 = vmul.f32 %v1090_v22, %v1076_v21 }
 0xa3f   :  { %v1093_v25 = vpack.c.bf16 %v1092_v24, %v1091_v23 }
 0xa41   :  { %2237 = vmatmul.msk.bf16.vlgmr.msra.gmra.mxu2 %vm1130_vm2, %v1093_v25 }
 0xac4   :  { %v1143_v26 = vpop.f32.mrf.mxu2 }
 0xac5   :  { %v1144_v27 = vadd.f32 %v2439_v55, %v1143_v26 }
 0xac7   :  { %v1148_v28 = vadd.f32 %v1144_v27, %v1035_v57 }
 0xac9   :  { %v1152_v56 = vsel %vm290_vm0, %v1148_v28, 0.0 }
 0xaca   :  { %1153 = vadd.xlane.f32.xlu2 %v1152_v56 }
 0xacc   :  { %v1145_v29 = vpop.f32.mrf.mxu2 }
 0xacd   :  { %v1146_v30 = vadd.f32 %v2439_v55, %v1145_v29 }
 0xacf   :  { %v1149_v60 = vadd.f32 %v1146_v30, %v1036_v58 }
 0xad1   :  { %v1155_v31 = vsel %vm290_vm0, %v1149_v60, 0.0 }
 0xad2   :  { %1156 = vadd.xlane.f32.xlu1 %v1155_v31 }
 0xb3d   :  { %v1154_v32 = vpop.xlane.xlu2 %1153 }
 0xb3e   :  { %v1158_v33 = vmul.f32 %v1154_v32, %v3134_v16 }
 0xb40   :  { %v1160_v34 = vsub.f32 %v1148_v28, %v1158_v33 }
 0xb42   :  { %v1162_v35 = vmul.f32 %v1160_v34, %v1160_v34 }
 0xb44   :  { %v1164_v36 = vsel %vm290_vm0, %v1162_v35, 0.0 }
 0xb45   :  { %v1157_v37 = vpop.xlane.xlu1 %1156  ;;  %1165 = vadd.xlane.f32.xlu0 %v1164_v36 }
 0xb46   :  { %v1159_v38 = vmul.f32 %v1157_v37, %v3134_v16 }
 0xb48   :  { %v1161_v40 = vsub.f32 %v1149_v60, %v1159_v38 }
 0xb4a   :  { %v1163_v41 = vmul.f32 %v1161_v40, %v1161_v40 }
 0xb4c   :  { %v1167_v42 = vsel %vm290_vm0, %v1163_v41, 0.0 }
 0xb4d   :  { %1168 = vadd.xlane.f32.xlu2 %v1167_v42 }
 0xbb8   :  { %v1166_v44 = vpop.xlane.xlu0 %1165 }
 0xbb9   :  { %v1170_v45 = vmul.f32 %v1166_v44, %v3134_v16 }
 0xbbb   :  { %v1172_v62 = vadd.f32 1e-12, %v1170_v45 }
 0xbbd   :  { %2497 = vrsqrt.f32 %v1172_v62  ;;  %vm1180_vm4 = vweird.f32 %v1172_v62 }
 0xbc0   :  { %v1169_v47 = vpop.xlane.xlu2 %1168 }
 0xbc1   :  { %v1171_v48 = vmul.f32 %v1169_v47, %v3134_v16 }
 0xbc3   :  { %v2498_v49 = vpop.eup %2497  ;;  %v1173_v50 = vadd.f32 1e-12, %v1171_v48 }
 0xbc4   :  { %v1175_v51 = vmul.f32 %v2498_v49, %v1172_v62  ;;  %vm1181_vm3 = vweird.f32 %v2498_v49 }
 0xbc5   :  { %2499 = vrsqrt.f32 %v1173_v50  ;;  %vm1182_vm5 = vmor %vm1180_vm4, %vm1181_vm3  ;;  %vm1190_vm7 = vweird.f32 %v1173_v50 }
 0xbc6   :  { %v1176_v52 = vmul.f32 %v2498_v49, %v1175_v51 }
 0xbc8   :  { %v1177_v53 = vmul.f32 0.5, %v1176_v52 }
 0xbca   :  { %v1178_v54 = vsub.f32 1.5, %v1177_v53 }
 0xbcb   :  { %v2500_v57 = vpop.eup %2499 }
 0xbcc   :  { %v1179_v58 = vmul.f32 %v2498_v49, %v1178_v54  ;;  %v1185_v39 = vmul.f32 %v2500_v57, %v1173_v50  ;;  %vm1191_vm6 = vweird.f32 %v2500_v57 }
 0xbcd   :  { %vm1192_vm11 = vmor %vm1190_vm7, %vm1191_vm6  ;;  %vm2071_vm6 = vcmask 1040384   ;;  %vm2144_vm7 = vcmask 123904  }
 0xbce   :  { %v1186_v59 = vmul.f32 %v2500_v57, %v1185_v39  ;;  %v1183_v63 = vsel %vm1182_vm5, %v2498_v49, %v1179_v58 }
 0xbcf   :  { %v1194_v3 = vmul.f32 %v1183_v63, %v1160_v34 }
 0xbd0   :  { %v1187_v0 = vmul.f32 0.5, %v1186_v59 }
 0xbd1   :  { %v1199_v8 = vmul.f32 %v2440_v2, %v1194_v3 }
 0xbd2   :  { %v1188_v1 = vsub.f32 1.5, %v1187_v0 }
 0xbd3   :  { %v3317_v11 = vadd.f32 %v2441_v7, %v1199_v8 }
 0xbd4   :  { %v1189_v4 = vmul.f32 %v2500_v57, %v1188_v1 }
 0xbd6   :  { %v1193_v6 = vsel %vm1192_vm11, %v2500_v57, %v1189_v4 }
 0xbd7   :  { %v1195_v9 = vmul.f32 %v1193_v6, %v1161_v40 }
 0xbd9   :  { %v1200_v10 = vmul.f32 %v2440_v2, %v1195_v9 }
 0xbdb   :  { %v3319_v12 = vadd.f32 %v2441_v7, %v1200_v10 }
 0xbdd   :  { %v1206_v13 = vpack.c.bf16 %v3319_v12, %v3317_v11 }
 0xbdf   :  { %2250 = vmatmul.msk.bf16.vlgmr.msrb.gmra.mxu1 %vm290_vm0, %v1206_v13 }
 0xc5c   :  { %v1241_v5 = vpop.f32.mrf.mxu1 }
 0xc5d   :  { %v3324_v61 = vadd.f32 %v2442_v14, %v1241_v5 }
 0xc5f   :  { %1284 = vrot.lane.b32.xlu2 %v3324_v61, %s2943_s20  ;;  %1247 = vrot.lane.b32.xlu1 %v3324_v61, %s2947_s4 }
 0xc64   :  { %v1243_v15 = vpop.f32.mrf.mxu1 }
 0xc65   :  { %v3334_v17 = vadd.f32 %v2442_v14, %v1243_v15 }
 0xc67   :  { %1375 = vrot.lane.b32.xlu2 %v3324_v61, %s2946_s27  ;;  %1310 = vrot.lane.b32.xlu1 %v3324_v61, %s2950_s0 }
 0xc6f   :  { %1586 = vrot.lane.b32.xlu2 %v3334_v17, %s2949_s30  ;;  %1442 = vrot.lane.b32.xlu1 %v3324_v61, %s2954_s22 }
 0xc77   :  { %1521 = vrot.lane.b32.xlu1 %v3334_v17, %s2947_s4 }
 0xc7f   :  { %1651 = vrot.lane.b32.xlu1 %v3334_v17, %s2948_s8 }
 0xc87   :  { %1714 = vrot.lane.b32.xlu1 %v3334_v17, %s2953_s1 }
 0xcb9   :  { %v1285_v18 = vpop.permute.xlu2 %1284 }
 0xcba   :  { %1305 = vmatpush.msrb.mxu0 %v1285_v18 }
 0xcc1   :  { %v1376_v27 = vpop.permute.xlu2 %1375 }
 0xcc9   :  { %v1587_v29 = vpop.permute.xlu2 %1586 }
 0xcd1   :  { %v1248_v19 = vpop.permute.xlu1 %1247 }
 0xcd2   :  { %2251 = vmatpush.xpose.msk.msrb.mxu3 %vm393_vm8, %v1248_v19 }
 0xcd5   :  { %2252 = vmatmul.msk.f32.vlgmr.msrb.gmra.mxu3 %vm393_vm8, %v3324_v61 }
 0xcd9   :  { %v1311_v25 = vpop.permute.xlu1 %1310 }
 0xce1   :  { %v1443_v56 = vpop.permute.xlu1 %1442 }
 0xce9   :  { %v1522_v32 = vpop.permute.xlu1 %1521 }
 0xcf1   :  { %v1652_v34 = vpop.permute.xlu1 %1651 }
 0xcf9   :  { %v1715_v38 = vpop.permute.xlu1 %1714 }
 0xd58   :  { %v1270_v20 = vpop.f32.mrf.mxu3 }
 0xd59   :  { %v1273_v21 = vsel %vm393_vm8, %v1270_v20, -inf }
 0xd5a   :  { %1274 = vmax.xlane.f32.xlu0 %v1273_v21 }
 0xd6e   :  { %1312 = vrot.lane.b32.xlu0 %v3324_v61, %s2949_s30 }
 0xd76   :  { %1377 = vrot.lane.b32.xlu0 %v3324_v61, %s2948_s8 }
 0xd7e   :  { %1440 = vrot.lane.b32.xlu0 %v3324_v61, %s2953_s1 }
 0xd86   :  { %1584 = vrot.lane.b32.xlu0 %v3334_v17, %s2950_s0 }
 0xd8e   :  { %1649 = vrot.lane.b32.xlu0 %v3334_v17, %s2946_s27 }
 0xdcd   :  { %v1275_v22 = vpop.xlane.xlu0 %1274 }
 0xdce   :  { %v1276_v23 = vsub.f32 %v1270_v20, %v1275_v22 }
 0xdd0   :  { %v1277_v24 = vmul.f32 1.442695, %v1276_v23 }
 0xdd2   :  { %2501 = vpow2.f32 %v1277_v24 }
 0xdd8   :  { %v2502_v55 = vpop.eup %2501 }
 0xdd9   :  { %v1279_v26 = vsel %vm393_vm8, %v2502_v55, 0.0 }
 0xdda   :  { %1280 = vadd.xlane.f32.xlu2 %v1279_v26 }
 0xde0   :  { %v1313_v28 = vpop.permute.xlu0 %1312 }
 0xde1   :  { %2254 = vmatpush.xpose.msk.msra.mxu1 %vm393_vm8, %v1313_v28 }
 0xde4   :  { %2255 = vmatmul.msk.f32.vlgmr.msra.gmra.mxu1 %vm393_vm8, %v1311_v25 }
 0xde5   :  { %2260 = vmatpush.xpose.msk.msrb.mxu1 %vm393_vm8, %v1443_v56 }
 0xde8   :  { %v1378_v30 = vpop.permute.xlu0 %1377 }
 0xde9   :  { %2266 = vmatpush.xpose.msk.msra.mxu1 %vm393_vm8, %v1587_v29  ;;  %2257 = vmatpush.xpose.msk.msra.mxu0 %vm393_vm8, %v1378_v30 }
 0xdf0   :  { %v1441_v60 = vpop.permute.xlu0 %1440 }
 0xdf1   :  { %2261 = vmatmul.msk.f32.vlgmr.msrb.gmra.mxu1 %vm393_vm8, %v1441_v60 }
 0xdf2   :  { %1716 = vrot.lane.b32.xlu2 %v3334_v17, %s2954_s22 }
 0xdf8   :  { %v1585_v31 = vpop.permute.xlu0 %1584 }
 0xdf9   :  { %2267 = vmatmul.msk.f32.vlgmr.msra.gmra.mxu1 %vm393_vm8, %v1585_v31 }
 0xe00   :  { %v1650_v42 = vpop.permute.xlu0 %1649 }
 0xe4d   :  { %v1281_v33 = vpop.xlane.xlu2 %1280 }
 0xe4e   :  { %2503 = vrcp.f32 %v1281_v33 }
 0xe54   :  { %v2504_v35 = vpop.eup %2503 }
 0xe55   :  { %v1283_v36 = vmul.f32 %v2504_v35, %v2502_v55  ;;  %v1717_v37 = vpop.permute.xlu2 %1716 }
 0xe56   :  { %2272 = vmatpush.xpose.msk.msrb.mxu1 %vm393_vm8, %v1717_v37 }
 0xe57   :  { %2253 = vmatmul.msk.f32.vlgmr.msrb.gmra.mxu0 %vm393_vm8, %v1283_v36 }
 0xe58   :  { %2263 = vmatpush.xpose.msk.msrb.mxu0 %vm393_vm8, %v1522_v32 }
 0xe59   :  { %2273 = vmatmul.msk.f32.vlgmr.msrb.gmra.mxu1 %vm393_vm8, %v1715_v38 }
 0xe5f   :  { %2258 = vmatmul.msk.f32.vlgmr.msra.gmra.mxu0 %vm393_vm8, %v1376_v27 }
 0xe60   :  { %2269 = vmatpush.xpose.msk.msra.mxu0 %vm393_vm8, %v1652_v34 }
 0xe61   :  { %v1335_v40 = vpop.f32.mrf.mxu1 }
 0xe62   :  { %v1338_v41 = vsel %vm393_vm8, %v1335_v40, -inf }
 0xe63   :  { %1339 = vmax.xlane.f32.xlu2 %v1338_v41 }
 0xe67   :  { %2264 = vmatmul.msk.f32.vlgmr.msrb.gmra.mxu0 %vm393_vm8, %v3334_v17 }
 0xe6e   :  { %v1465_v43 = vpop.f32.mrf.mxu1 }
 0xe6f   :  { %2270 = vmatmul.msk.f32.vlgmr.msra.gmra.mxu0 %vm393_vm8, %v1650_v42  ;;  %v1468_v44 = vsel %vm393_vm8, %v1465_v43, -inf }
 0xe70   :  { %1469 = vmax.xlane.f32.xlu1 %v1468_v44 }
 0xe76   :  { %v1609_v50 = vpop.f32.mrf.mxu1 }
 0xe77   :  { %v1612_v54 = vsel %vm393_vm8, %v1609_v50, -inf }
 0xed4   :  { %v3381_v45 = vpop.f32.mrf.mxu0 }
 0xed6   :  { %v1340_v62 = vpop.xlane.xlu2 %1339  ;;  %v1739_v59 = vpop.f32.mrf.mxu1 }
 0xed7   :  { %v1341_v46 = vsub.f32 %v1335_v40, %v1340_v62  ;;  %v1742_v0 = vsel %vm393_vm8, %v1739_v59, -inf }
 0xed9   :  { %v1342_v49 = vmul.f32 1.442695, %v1341_v46 }
 0xedb   :  { %2505 = vpow2.f32 %v1342_v49 }
 0xedc   :  { %v1400_v47 = vpop.f32.mrf.mxu0 }
 0xedd   :  { %v1403_v48 = vsel %vm393_vm8, %v1400_v47, -inf }
 0xede   :  { %1404 = vmax.xlane.f32.xlu0 %v1403_v48 }
 0xee1   :  { %v2506_v39 = vpop.eup %2505 }
 0xee2   :  { %v1344_v63 = vsel %vm393_vm8, %v2506_v39, 0.0 }
 0xee3   :  { %v1470_v51 = vpop.xlane.xlu1 %1469 }
 0xee4   :  { %v1471_v52 = vsub.f32 %v1465_v43, %v1470_v51  ;;  %v1544_v53 = vpop.f32.mrf.mxu0 }
 0xee5   :  { %v1547_v57 = vsel %vm393_vm8, %v1544_v53, -inf }
 0xee6   :  { %1613 = vmax.xlane.f32.xlu0 %v1612_v54  ;;  %1548 = vmax.xlane.f32.xlu2 %v1547_v57  ;;  %v1472_v58 = vmul.f32 1.442695, %v1471_v52 }
 0xee8   :  { %2507 = vpow2.f32 %v1472_v58 }
 0xeec   :  { %v1674_v24 = vpop.f32.mrf.mxu0 }
 0xeed   :  { %v1677_v27 = vsel %vm393_vm8, %v1674_v24, -inf }
 0xeee   :  { %1345 = vadd.xlane.f32.xlu0 %v1344_v63  ;;  %1743 = vmax.xlane.f32.xlu2 %v1742_v0  ;;  %v2508_v1 = vpop.eup %2507 }
 0xeef   :  { %v1474_v2 = vsel %vm393_vm8, %v2508_v1, 0.0 }
 0xef6   :  { %1475 = vadd.xlane.f32.xlu2 %v1474_v2 }
 0xf02   :  { %1349 = vrot.lane.b32.xlu0 %v3324_v61, %s2952_s10 }
 0xf0a   :  { %1479 = vrot.lane.b32.xlu0 %v3324_v61, %s2955_s29 }
 0xf0e   :  { %1414 = vrot.lane.b32.xlu2 %v3324_v61, %s2951_s21 }
 0xf12   :  { %1558 = vrot.lane.b32.xlu0 %v3334_v17, %s2943_s20 }
 0xf16   :  { %1623 = vrot.lane.b32.xlu2 %v3334_v17, %s2952_s10 }
 0xf1a   :  { %1688 = vrot.lane.b32.xlu0 %v3334_v17, %s2951_s21 }
 0xf51   :  { %v1405_v3 = vpop.xlane.xlu0 %1404 }
 0xf52   :  { %v1406_v19 = vsub.f32 %v1400_v47, %v1405_v3 }
 0xf54   :  { %v1407_v21 = vmul.f32 1.442695, %v1406_v19 }
 0xf59   :  { %v1614_v4 = vpop.xlane.xlu0 %1613  ;;  %v1549_v6 = vpop.xlane.xlu2 %1548 }
 0xf5a   :  { %v1615_v7 = vsub.f32 %v1609_v50, %v1614_v4  ;;  %v1550_v25 = vsub.f32 %v1544_v53, %v1549_v6 }
 0xf5c   :  { %v1616_v8 = vmul.f32 1.442695, %v1615_v7  ;;  %v1551_v28 = vmul.f32 1.442695, %v1550_v25 }
 0xf5e   :  { %2509 = vpow2.f32 %v1616_v8 }
 0xf61   :  { %v1744_v9 = vpop.xlane.xlu2 %1743  ;;  %v1346_v61 = vpop.xlane.xlu0 %1345 }
 0xf62   :  { %v1745_v10 = vsub.f32 %v1739_v59, %v1744_v9  ;;  %v2357_v9 = vld [vmem:[%s3496_s7 + $0x18] sm:$0xff] }
 0xf63   :  { %1826 = vmatpush.bf16.msrb.mxu0 %v2357_v9 }
 0xf64   :  { %v2510_v13 = vpop.eup %2509  ;;  %v1746_v14 = vmul.f32 1.442695, %v1745_v10  ;;  %v2356_v10 = vld [vmem:[%s3496_s7 + $0x10] sm:$0xff] }
 0xf65   :  { %v1618_v5 = vsel %vm393_vm8, %v2510_v13, 0.0 }
 0xf66   :  { %2511 = vpow2.f32 %v1746_v14  ;;  %1619 = vadd.xlane.f32.xlu1 %v1618_v5 }
 0xf67   :  { %2513 = vrcp.f32 %v1346_v61  ;;  %1827 = vmatpush.bf16.msrb.mxu0 %v2356_v10 }
 0xf69   :  { %v1476_v15 = vpop.xlane.xlu2 %1475 }
 0xf6a   :  { %2515 = vrcp.f32 %v1476_v15 }
 0xf6b   :  { %2517 = vpow2.f32 %v1407_v21 }
 0xf6c   :  { %v3402_v18 = vpop.eup %2511  ;;  %2519 = vpow2.f32 %v1551_v28  ;;  %v2443_v28 = vld [vmem:[#allocation13 + $0x1] ss:$0 sm:$0xff] }
 0xf6d   :  { %v1748_v20 = vsel %vm393_vm8, %v3402_v18, 0.0  ;;  %v2514_v22 = vpop.eup %2513 }
 0xf6e   :  { %1749 = vadd.xlane.f32.xlu1 %v1748_v20  ;;  %v1348_v55 = vmul.f32 %v2514_v22, %v2506_v39 }
 0xf70   :  { %v2516_v56 = vpop.eup %2515 }
 0xf71   :  { %v1415_v23 = vpop.permute.xlu2 %1414  ;;  %v2518_v29 = vpop.eup %2517  ;;  %v1478_v30 = vmul.f32 %v2516_v56, %v2508_v1 }
 0xf72   :  { %1435 = vmatpush.msrb.mxu2 %v1415_v23  ;;  %v1409_v31 = vsel %vm393_vm8, %v2518_v29, 0.0  ;;  %v2520_v33 = vpop.eup %2519 }
 0xf73   :  { %v1553_v35 = vsel %vm393_vm8, %v2520_v33, 0.0 }
 0xf74   :  { %v1350_v26 = vpop.permute.xlu0 %1349 }
 0xf75   :  { %1370 = vmatpush.msra.mxu3 %v1350_v26 }
 0xf76   :  { %2256 = vmatmul.msk.f32.vlgmr.msra.gmra.mxu3 %vm393_vm8, %v1348_v55  ;;  %1678 = vmax.xlane.f32.xlu1 %v1677_v27 }
 0xf79   :  { %v1624_v32 = vpop.permute.xlu2 %1623 }
 0xf7c   :  { %v1480_v60 = vpop.permute.xlu0 %1479 }
 0xf7d   :  { %1500 = vmatpush.msrb.mxu3 %v1480_v60 }
 0xf7e   :  { %1410 = vadd.xlane.f32.xlu1 %v1409_v31  ;;  %2262 = vmatmul.msk.f32.vlgmr.msrb.gmra.mxu3 %vm393_vm8, %v1478_v30 }
 0xf7f   :  { %1644 = vmatpush.msra.mxu3 %v1624_v32 }
 0xf84   :  { %v1559_v34 = vpop.permute.xlu0 %1558 }
 0xf85   :  { %1579 = vmatpush.msra.mxu2 %v1559_v34 }
 0xf86   :  { %1554 = vadd.xlane.f32.xlu1 %v1553_v35 }
 0xf8c   :  { %v1689_v50 = vpop.permute.xlu0 %1688 }
 0xfd9   :  { %v1620_v36 = vpop.xlane.xlu1 %1619 }
 0xfda   :  { %2521 = vrcp.f32 %v1620_v36 }
 0xfe0   :  { %v2522_v37 = vpop.eup %2521 }
 0xfe1   :  { %v1622_v38 = vmul.f32 %v2522_v37, %v2510_v13  ;;  %v1750_v40 = vpop.xlane.xlu1 %1749 }
 0xfe3   :  { %2268 = vmatmul.msk.f32.vlgmr.msra.gmra.mxu3 %vm393_vm8, %v1622_v38 }
 0xfe9   :  { %v1679_v41 = vpop.xlane.xlu1 %1678 }
 0xfea   :  { %v1680_v42 = vsub.f32 %v1674_v24, %v1679_v41 }
 0xfec   :  { %v1681_v43 = vmul.f32 1.442695, %v1680_v42 }
 0xfee   :  { %2523 = vpow2.f32 %v1681_v43 }
 0xff1   :  { %v1411_v44 = vpop.xlane.xlu1 %1410 }
 0xff2   :  { %2525 = vrcp.f32 %v1411_v44 }
 0xff4   :  { %v2524_v62 = vpop.eup %2523 }
 0xff5   :  { %v1683_v46 = vsel %vm393_vm8, %v2524_v62, 0.0 }
 0xff6   :  { %1684 = vadd.xlane.f32.xlu1 %v1683_v46 }
 0xff8   :  { %v2526_v47 = vpop.eup %2525 }
 0xff9   :  { %v1413_v48 = vmul.f32 %v2526_v47, %v2518_v29  ;;  %v1555_v49 = vpop.xlane.xlu1 %1554  ;;  %v1372_v53 = vpop.f32.mrf.mxu3  ;;  %v2358_v47 = vld [vmem:[%s3500_s11 + $0x10] sm:$0xff] }
 0xffa   :  { %2527 = vrcp.f32 %v1555_v49 }
 0xffb   :  { %2259 = vmatmul.msk.f32.vlgmr.msrb.gmra.mxu2 %vm393_vm8, %v1413_v48 }
 0xffc   :  { %1709 = vmatpush.msrb.mxu2 %v1689_v50 }
0x1000   :  { %v2528_v51 = vpop.eup %2527 }
0x1001   :  { %v1557_v52 = vmul.f32 %v2528_v51, %v2520_v33  ;;  %v1502_v54 = vpop.f32.mrf.mxu3 }
0x1003   :  { %2265 = vmatmul.msk.f32.vlgmr.msra.gmra.mxu2 %vm393_vm8, %v1557_v52 }
0x100f   :  { %1753 = vrot.lane.b32.xlu1 %v3334_v17, %s2955_s29 }
0x1066   :  { %v1646_v57 = vpop.f32.mrf.mxu3 }
0x1067   :  { %v2416_v58 = vpack.i.bf16 %v1646_v57, %v1372_v53 }
0x1069   :  { %2417 = vrot.lane.b32.xlu2 %v2416_v58, %s2935_s9  ;;  %v1685_v39 = vpop.xlane.xlu1 %1684 }
0x106a   :  { %2529 = vrcp.f32 %v1685_v39 }
0x106b   :  { %2531 = vrcp.f32 %v1750_v40 }
0x1070   :  { %v2530_v59 = vpop.eup %2529 }
0x1071   :  { %v1687_v63 = vmul.f32 %v2530_v59, %v2524_v62  ;;  %v2532_v0 = vpop.eup %2531 }
0x1072   :  { %v1752_v1 = vmul.f32 %v2532_v0, %v3402_v18 }
0x1073   :  { %2271 = vmatmul.msk.f32.vlgmr.msrb.gmra.mxu2 %vm393_vm8, %v1687_v63 }
0x107e   :  { %v1437_v17 = vpop.f32.mrf.mxu2 }
0x1081   :  { %v1754_v2 = vpop.permute.xlu1 %1753 }
0x1082   :  { %1774 = vmatpush.msrb.mxu3 %v1754_v2 }
0x1083   :  { %2274 = vmatmul.msk.f32.vlgmr.msrb.gmra.mxu3 %vm393_vm8, %v1752_v1 }
0x1086   :  { %v1581_v3 = vpop.f32.mrf.mxu2 }
0x10c3   :  { %v2418_v13 = vpop.permute.xlu2 %2417 }
0x10c4   :  { %v2420_v14 = vunpack.i.h.bf16 %v2418_v13  ;;  %v2419_v5 = vunpack.i.l.bf16 %v2418_v13 }
0x10c6   :  { %v1517_v20 = vsel %vm393_vm8, %v3381_v45, %v2419_v5  ;;  %v1791_v21 = vsel %vm393_vm8, %v1581_v3, %v2420_v14 }
0x10f6   :  { %v1711_v4 = vpop.f32.mrf.mxu2 }
0x10f7   :  { %v2421_v6 = vpack.i.bf16 %v1711_v4, %v1437_v17  ;;  %v2444_v17 = vld [vmem:[#allocation14 + $0x1] ss:$0 sm:$0xff] }
0x10f9   :  { %2422 = vrot.lane.b32.xlu0 %v2421_v6, %s2928_s3 }
0x1106   :  { %v1776_v7 = vpop.f32.mrf.mxu3 }
0x1107   :  { %v2426_v8 = vpack.i.bf16 %v1776_v7, %v1502_v54  ;;  %v2445_v7 = vld [vmem:[#allocation16 + $0x1] ss:$0 sm:$0xff] }
0x1109   :  { %2427 = vrot.lane.b32.xlu2 %v2426_v8, %s2956_s14 }
0x1163   :  { %v2428_v61 = vpop.permute.xlu2 %2427 }
0x1164   :  { %v2430_v22 = vunpack.i.h.bf16 %v2428_v61  ;;  %v2429_v23 = vunpack.i.l.bf16 %v2428_v61  ;;  %v2363_v61 = vld [vmem:[%s3502_s13 + $0x38] sm:$0xff] }
0x1165   :  { %1998 = vmatpush.bf16.msra.mxu1 %v2363_v61 }
0x116b   :  { %v2423_v15 = vpop.permute.xlu0 %2422 }
0x116c   :  { %v2425_v18 = vunpack.i.h.bf16 %v2423_v15  ;;  %v2424_v19 = vunpack.i.l.bf16 %v2423_v15  ;;  %v2362_v15 = vld [vmem:[%s3502_s13 + $0x30] sm:$0xff] }
0x116d   :  { %1999 = vmatpush.bf16.msra.mxu1 %v2362_v15 }
0x116e   :  { %v1792_v24 = vsel %vm663_vm9, %v1791_v21, %v2425_v18  ;;  %v1518_v25 = vsel %vm663_vm9, %v1517_v20, %v2424_v19  ;;  %v2361_v18 = vld [vmem:[%s3502_s13 + $0x28] sm:$0xff]  ;;  %v2360_v19 = vld [vmem:[%s3502_s13 + $0x20] sm:$0xff] }
0x116f   :  { %v1519_v55 = vsel %vm665_vm10, %v1518_v25, %v2429_v23  ;;  %v1793_v26 = vsel %vm665_vm10, %v1792_v24, %v2430_v22  ;;  %v2446_v20 = vld [vmem:[#allocation17 + $0x1] ss:$0 sm:$0xff] }
0x1170   :  { %v1794_v27 = vpack.c.bf16 %v1793_v26, %v1519_v55 }
0x1171   :  { %2000 = vmatpush.bf16.msra.mxu1 %v2361_v18 }
0x1172   :  { %2287 = vmatmul.msk.bf16.vlgmr.msrb.gmra.mxu0 %vm290_vm0, %v1794_v27 }
0x1175   :  { %2001 = vmatpush.bf16.msra.mxu1 %v2360_v19 }
0x11ef   :  { %v1829_v56 = vpop.f32.mrf.mxu0 }
0x11f0   :  { %v1830_v29 = vadd.f32 %v2443_v28, %v1829_v56 }
0x11f2   :  { %v1834_v45 = vadd.f32 %v1830_v29, %v3317_v11 }
0x11f4   :  { %v1840_v30 = vsel %vm290_vm0, %v1834_v45, 0.0 }
0x11f5   :  { %1841 = vadd.xlane.f32.xlu0 %v1840_v30 }
0x11f7   :  { %v1831_v60 = vpop.f32.mrf.mxu0 }
0x11f8   :  { %v1832_v31 = vadd.f32 %v2443_v28, %v1831_v60 }
0x11fa   :  { %v1835_v32 = vadd.f32 %v1832_v31, %v3319_v12  ;;  %v2359_v12 = vld [vmem:[%s3500_s11 + $0x18] sm:$0xff] }
0x11fb   :  { %1926 = vmatpush.bf16.msra.mxu2 %v2359_v12 }
0x11fc   :  { %v1843_v33 = vsel %vm290_vm0, %v1835_v32, 0.0 }
0x11fd   :  { %1844 = vadd.xlane.f32.xlu2 %v1843_v33 }
0x11ff   :  { %1927 = vmatpush.bf16.msra.mxu2 %v2358_v47 }
0x1268   :  { %v1842_v34 = vpop.xlane.xlu0 %1841 }
0x1269   :  { %v1846_v35 = vmul.f32 %v1842_v34, %v3134_v16 }
0x126b   :  { %v1848_v36 = vsub.f32 %v1834_v45, %v1846_v35 }
0x126d   :  { %v1850_v37 = vmul.f32 %v1848_v36, %v1848_v36 }
0x126f   :  { %v1852_v38 = vsel %vm290_vm0, %v1850_v37, 0.0 }
0x1270   :  { %v1845_v40 = vpop.xlane.xlu2 %1844  ;;  %1853 = vadd.xlane.f32.xlu1 %v1852_v38 }
0x1271   :  { %v1847_v11 = vmul.f32 %v1845_v40, %v3134_v16 }
0x1273   :  { %v1849_v41 = vsub.f32 %v1835_v32, %v1847_v11  ;;  %v2447_v11 = vld [vmem:[#allocation19 + $0x1] ss:$0 sm:$0xff] }
0x1275   :  { %v1851_v42 = vmul.f32 %v1849_v41, %v1849_v41 }
0x1277   :  { %v1855_v43 = vsel %vm290_vm0, %v1851_v42, 0.0 }
0x1278   :  { %1856 = vadd.xlane.f32.xlu2 %v1855_v43 }
0x12e3   :  { %v1854_v44 = vpop.xlane.xlu1 %1853 }
0x12e4   :  { %v1858_v62 = vmul.f32 %v1854_v44, %v3134_v16 }
0x12e6   :  { %v1860_v46 = vadd.f32 1e-12, %v1858_v62 }
0x12e8   :  { %2533 = vrsqrt.f32 %v1860_v46  ;;  %vm1868_vm9 = vweird.f32 %v1860_v46 }
0x12eb   :  { %v1857_v48 = vpop.xlane.xlu2 %1856 }
0x12ec   :  { %v1859_v49 = vmul.f32 %v1857_v48, %v3134_v16 }
0x12ee   :  { %v2534_v50 = vpop.eup %2533  ;;  %v1861_v51 = vadd.f32 1e-12, %v1859_v49 }
0x12ef   :  { %v1863_v52 = vmul.f32 %v2534_v50, %v1860_v46  ;;  %vm1869_vm8 = vweird.f32 %v2534_v50 }
0x12f0   :  { %2535 = vrsqrt.f32 %v1861_v51  ;;  %vm1870_vm10 = vmor %vm1868_vm9, %vm1869_vm8  ;;  %vm1878_vm13 = vweird.f32 %v1861_v51 }
0x12f1   :  { %v1864_v53 = vmul.f32 %v2534_v50, %v1863_v52 }
0x12f3   :  { %v1865_v54 = vmul.f32 0.5, %v1864_v53 }
0x12f5   :  { %v1866_v57 = vsub.f32 1.5, %v1865_v54 }
0x12f6   :  { %v2536_v58 = vpop.eup %2535 }
0x12f7   :  { %v1867_v39 = vmul.f32 %v2534_v50, %v1866_v57  ;;  %v1873_v59 = vmul.f32 %v2536_v58, %v1861_v51  ;;  %vm1879_vm12 = vweird.f32 %v2536_v58 }
0x12f8   :  { %vm1880_vm14 = vmor %vm1878_vm13, %vm1879_vm12 }
0x12f9   :  { %v1874_v63 = vmul.f32 %v2536_v58, %v1873_v59  ;;  %v1871_v0 = vsel %vm1870_vm10, %v2534_v50, %v1867_v39 }
0x12fa   :  { %v1882_v3 = vmul.f32 %v1871_v0, %v1848_v36  ;;  %v2365_v0 = vld [vmem:[#allocation23 + $0x8] sm:$0xff] }
0x12fb   :  { %v1875_v1 = vmul.f32 0.5, %v1874_v63  ;;  %2103 = vmatpush.bf16.msra.mxu3 %v2365_v0 }
0x12fc   :  { %v1887_v8 = vmul.f32 %v2444_v17, %v1882_v3 }
0x12fd   :  { %v1876_v2 = vsub.f32 1.5, %v1875_v1 }
0x12fe   :  { %v1892_v13 = vadd.f32 %v2445_v7, %v1887_v8 }
0x12ff   :  { %v1877_v4 = vmul.f32 %v2536_v58, %v1876_v2  ;;  %v2364_v2 = vld [vmem:[#allocation23] sm:$0xff] }
0x1300   :  { %2104 = vmatpush.bf16.msra.mxu3 %v2364_v2 }
0x1301   :  { %v1881_v6 = vsel %vm1880_vm14, %v2536_v58, %v1877_v4 }
0x1302   :  { %v1883_v9 = vmul.f32 %v1881_v6, %v1849_v41 }
0x1304   :  { %v1888_v10 = vmul.f32 %v2444_v17, %v1883_v9 }
0x1306   :  { %v1893_v14 = vadd.f32 %v2445_v7, %v1888_v10 }
0x1308   :  { %v1894_v5 = vpack.c.bf16 %v1893_v14, %v1892_v13 }
0x130a   :  { %2300 = vmatmul.msk.bf16.vlgmr.msra.gmra.mxu2 %vm290_vm0, %v1894_v5 }
0x138d   :  { %v1929_v21 = vpop.f32.mrf.mxu2 }
0x138e   :  { %v1930_v22 = vadd.f32 %v2446_v20, %v1929_v21 }
0x1390   :  { %v1936_v23 = vmul.f32 0.044715, %v1930_v22  ;;  %v1934_v34 = vmul.f32 0.5, %v1930_v22 }
0x1392   :  { %v1938_v24 = vmul.f32 %v1936_v23, %v1930_v22 }
0x1394   :  { %v1940_v25 = vmul.f32 %v1938_v24, %v1930_v22  ;;  %v2449_v24 = vld [vmem:[#allocation22 + $0x1] ss:$0 sm:$0xff] }
0x1395   :  { %v1931_v55 = vpop.f32.mrf.mxu2 }
0x1396   :  { %v1942_v26 = vadd.f32 %v1940_v25, %v1930_v22  ;;  %v1932_v27 = vadd.f32 %v2446_v20, %v1931_v55 }
0x1398   :  { %v1937_v28 = vmul.f32 0.044715, %v1932_v27  ;;  %v1944_v56 = vmul.f32 0.7978846, %v1942_v26  ;;  %v1935_v35 = vmul.f32 0.5, %v1932_v27 }
0x139a   :  { %v1939_v29 = vmul.f32 %v1937_v28, %v1932_v27  ;;  %2537 = vtanh.f32 %v1944_v56 }
0x139c   :  { %v1941_v45 = vmul.f32 %v1939_v29, %v1932_v27 }
0x139e   :  { %v1943_v30 = vadd.f32 %v1941_v45, %v1932_v27  ;;  %v2367_v45 = vld [vmem:[%s3508_s19 + $0x8] sm:$0xff] }
0x139f   :  { %2137 = vmatpush.bf16.msra.mxu0 %v2367_v45 }
0x13a0   :  { %v1945_v60 = vmul.f32 0.7978846, %v1943_v30  ;;  %v2538_v31 = vpop.eup %2537  ;;  %v2366_v30 = vld [vmem:[%s3508_s19] sm:$0xff] }
0x13a1   :  { %v1948_v32 = vadd.f32 1.0, %v2538_v31 }
0x13a2   :  { %2539 = vtanh.f32 %v1945_v60  ;;  %v2450_v60 = vld [vmem:[%s3507_s18] ss:$0 sm:$0xff] }
0x13a3   :  { %v1950_v37 = vmul.f32 %v1948_v32, %v1934_v34  ;;  %2138 = vmatpush.bf16.msra.mxu0 %v2366_v30 }
0x13a8   :  { %v2540_v33 = vpop.eup %2539 }
0x13a9   :  { %v1949_v36 = vadd.f32 1.0, %v2540_v33 }
0x13ab   :  { %v1951_v38 = vmul.f32 %v1949_v36, %v1935_v35 }
0x13ad   :  { %v1952_v40 = vpack.c.bf16 %v1951_v38, %v1950_v37 }
0x13af   :  { %2325 = vmatmul.msk.bf16.vlgmr.msra.gmra.mxu1 %vm1130_vm2, %v1952_v40 }
0x142c   :  { %v2003_v41 = vpop.f32.mrf.mxu1 }
0x142d   :  { %v2004_v42 = vadd.f32 %v2447_v11, %v2003_v41 }
0x142f   :  { %v2008_v43 = vadd.f32 %v2004_v42, %v1892_v13 }
0x1431   :  { %v2014_v12 = vsel %vm290_vm0, %v2008_v43, 0.0 }
0x1432   :  { %2015 = vadd.xlane.f32.xlu2 %v2014_v12 }
0x1434   :  { %v2005_v44 = vpop.f32.mrf.mxu1 }
0x1435   :  { %v2006_v62 = vadd.f32 %v2447_v11, %v2005_v44 }
0x1437   :  { %v2009_v46 = vadd.f32 %v2006_v62, %v1893_v14 }
0x1439   :  { %v2017_v47 = vsel %vm290_vm0, %v2009_v46, 0.0 }
0x143a   :  { %2018 = vadd.xlane.f32.xlu0 %v2017_v47 }
0x14a5   :  { %v2016_v48 = vpop.xlane.xlu2 %2015 }
0x14a6   :  { %v2020_v49 = vmul.f32 %v2016_v48, %v3134_v16 }
0x14a8   :  { %v2022_v50 = vsub.f32 %v2008_v43, %v2020_v49 }
0x14aa   :  { %v2024_v51 = vmul.f32 %v2022_v50, %v2022_v50 }
0x14ac   :  { %v2026_v52 = vsel %vm290_vm0, %v2024_v51, 0.0 }
0x14ad   :  { %v2019_v53 = vpop.xlane.xlu0 %2018  ;;  %2027 = vadd.xlane.f32.xlu1 %v2026_v52 }
0x14ae   :  { %v2021_v54 = vmul.f32 %v2019_v53, %v3134_v16 }
0x14b0   :  { %v2023_v57 = vsub.f32 %v2009_v46, %v2021_v54 }
0x14b2   :  { %v2025_v58 = vmul.f32 %v2023_v57, %v2023_v57 }
0x14b4   :  { %v2029_v39 = vsel %vm290_vm0, %v2025_v58, 0.0 }
0x14b5   :  { %2030 = vadd.xlane.f32.xlu0 %v2029_v39 }
0x1520   :  { %v2028_v59 = vpop.xlane.xlu1 %2027 }
0x1521   :  { %v2032_v63 = vmul.f32 %v2028_v59, %v3134_v16 }
0x1523   :  { %v2034_v1 = vadd.f32 1e-12, %v2032_v63 }
0x1525   :  { %2541 = vrsqrt.f32 %v2034_v1  ;;  %vm2042_vm1 = vweird.f32 %v2034_v1 }
0x1528   :  { %v2031_v17 = vpop.xlane.xlu0 %2030 }
0x1529   :  { %v2033_v3 = vmul.f32 %v2031_v17, %v3134_v16  ;;  %v2448_v16 = vld [vmem:[#allocation20 + $0x1] ss:$0 sm:$0xff] }
0x152b   :  { %v2542_v4 = vpop.eup %2541  ;;  %v2035_v6 = vadd.f32 1e-12, %v2033_v3 }
0x152c   :  { %v2037_v7 = vmul.f32 %v2542_v4, %v2034_v1  ;;  %vm2043_vm15 = vweird.f32 %v2542_v4 }
0x152d   :  { %2543 = vrsqrt.f32 %v2035_v6  ;;  %vm2044_vm2 = vmor %vm2042_vm1, %vm2043_vm15  ;;  %vm2052_vm4 = vweird.f32 %v2035_v6 }
0x152e   :  { %v2038_v8 = vmul.f32 %v2542_v4, %v2037_v7 }
0x1530   :  { %v2039_v9 = vmul.f32 0.5, %v2038_v8 }
0x1532   :  { %v2040_v10 = vsub.f32 1.5, %v2039_v9 }
0x1533   :  { %v2544_v13 = vpop.eup %2543 }
0x1534   :  { %v2047_v14 = vmul.f32 %v2544_v13, %v2035_v6  ;;  %v2041_v5 = vmul.f32 %v2542_v4, %v2040_v10  ;;  %vm2053_vm3 = vweird.f32 %v2544_v13 }
0x1535   :  { %vm2054_vm5 = vmor %vm2052_vm4, %vm2053_vm3 }
0x1536   :  { %v2048_v61 = vmul.f32 %v2544_v13, %v2047_v14  ;;  %v2045_v18 = vsel %vm2044_vm2, %v2542_v4, %v2041_v5 }
0x1537   :  { %v2056_v21 = vmul.f32 %v2045_v18, %v2022_v50 }
0x1538   :  { %v2049_v15 = vmul.f32 0.5, %v2048_v61 }
0x1539   :  { %v2061_v25 = vmul.f32 %v2448_v16, %v2056_v21 }
0x153a   :  { %v2050_v19 = vsub.f32 1.5, %v2049_v15 }
0x153b   :  { %v2066_v27 = vadd.f32 %v2449_v24, %v2061_v25 }
0x153c   :  { %v2051_v20 = vmul.f32 %v2544_v13, %v2050_v19 }
0x153e   :  { %v2055_v22 = vsel %vm2054_vm5, %v2544_v13, %v2051_v20 }
0x153f   :  { %v2057_v23 = vmul.f32 %v2055_v22, %v2023_v57 }
0x1541   :  { %v2062_v55 = vmul.f32 %v2448_v16, %v2057_v23 }
0x1543   :  { %v2067_v26 = vadd.f32 %v2449_v24, %v2062_v55 }
0x1545   :  { %v2069_v28 = vrot.slane %v2067_v26, 7 }
0x1547   :  { %v2072_v56 = vsel %vm2071_vm6, %v2066_v27, %v2069_v28 }
0x1548   :  { %v2073_v29 = vpack.c.bf16 %v2072_v56, %v2072_v56 }
0x154a   :  { %2334 = vmatmul.msk.bf16.vlgmr.msra.gmra.mxu3 %vm290_vm0, %v2073_v29 }
0x15cd   :  { %v2106_v31 = vpop.f32.mrf.mxu3 }
0x15ce   :  { %v2107_v32 = vadd.f32 %v2450_v60, %v2106_v31 }
0x15d0   :  { %2545 = vtanh.f32 %v2107_v32 }
0x15d5   :  { %v2108_v33 = vpop.f32.mrf.mxu3 }
0x15d6   :  { %v2546_v34 = vpop.eup %2545 }
0x15d7   :  { %v2111_v35 = vpack.c.bf16 %v2546_v34, %v2546_v34 }
0x15d9   :  { %2343 = vmatmul.msk.bf16.vlgmr.msra.gmra.mxu0 %vm290_vm0, %v2111_v35 }
0x1656   :  { %v2140_v36 = vpop.f32.mrf.mxu0 }
0x1657   :  { %2145 = vst.msk [vmem:[#allocation25] sm:$0x3] %vm2144_vm7, %v2140_v36 }
0x1658   :  { %2156 = dma.vmem_to_hbm [thread:$0]  %s2152_s24, 32, %s2154_s17, [#allocation4]  }
0x165e   :  { %v2142_v37 = vpop.f32.mrf.mxu0 }
0x165f   :  { %2923 = dma.done.wait [#allocation4], 32  }
0x1660   :  { %2924 = vsyncadd [#allocation4], 4294967264 }
0x1661   :  { %2161 = vsyncpa [#allocation3], 1 }
0x1662   :  { %2162 = vsyncpa [#allocation6], 1 }
0x1663   :  { %2163 = vsyncpa [#allocation9], 1 }
0x1664   :  { %2164 = vsyncpa [#allocation12], 1 }
0x1665   :  { %2165 = vsyncpa [#allocation15], 1 }
0x1666   :  { %2166 = vsyncpa [#allocation18], 1 }
0x1667   :  { %2167 = vsyncpa [#allocation21], 1 }
0x1668   :  { %2168 = vsyncpa [#allocation24], 1 }
0x1669   :  { %2169 = vsyncpa [#allocation4], 1 }

</bundles_post_ra>
